<compile_context>
chip_gen: v5e
topology: v5e:2x2
jax: 0.10.0
libtpu: 0.0.40
codegen_flags: <defaults>
</compile_context>

<pallas_src>
import functools

import jax
import jax.numpy as jnp
from jax.experimental import pallas as pl
from jax.experimental.pallas import tpu as pltpu


def _round_up(x, m):
    return ((x + m - 1) // m) * m


@functools.lru_cache(maxsize=None)
def _vmem_limit_bytes():
    """Generation-aware scoped-VMEM budget (~48 MiB on v7x, ~96 MiB on v5e/v6e)."""
    cap = 128 * 1024 * 1024
    try:
        cap = int(pltpu.get_tpu_info().vmem_capacity_bytes)
    except Exception:
        pass
    return max(32 * 1024 * 1024, min((cap * 3) // 4, 96 * 1024 * 1024))


# ----------------------------------------------------------------------------
# 3x3 conv (stride 1) + bias + ReLU: K-stacked single MXU matmul, small row halo
# ----------------------------------------------------------------------------
def _conv_kstack_kernel(xc_ref, xh_ref, w_ref, b_ref, o_ref, *, shifts, tile_m):
    # xc_ref: (1, TILE_M, Cin) current tile; xh_ref: (1, HS, Cin) small row halo.
    xx = jnp.concatenate([xc_ref[0], xh_ref[0]], axis=0)            # (TILE_M+HS, Cin)
    # K-stacked im2col: 9 shifted views concatenated along K -> one matmul; the
    # accumulation happens inside the MXU's f32 accumulator (no 9x acc passes).
    im = jnp.concatenate([xx[s:s + tile_m, :] for s in shifts], axis=1)  # (TILE_M, 9*Cin)
    acc = jnp.dot(im, w_ref[...], preferred_element_type=jnp.float32)    # (TILE_M, Cout)
    acc = jnp.maximum(acc + b_ref[...], 0.0)
    o_ref[0] = acc.astype(o_ref.dtype)


def conv3x3_relu_nhwc(x, w, b, padding, *, tile_m=1024):
    """x: (B, H, W, Cin) bf16; w: (Cout, Cin, 3, 3) f32; b: (Cout,) f32
    -> (B, Ho, Wo, Cout) bf16 (stride-1 3x3 conv + bias + ReLU)."""
    B, H, W, Cin = x.shape
    Cout = w.shape[0]
    if padding > 0:
        x = jnp.pad(x, ((0, 0), (padding, padding), (padding, padding), (0, 0)))
    Hp, Wp = x.shape[1], x.shape[2]
    Ho, Wo = Hp - 2, Wp - 2
    Lo = Ho * Wp                                   # output rows (incl. Wp-Wo junk cols)

    halo = 2 * Wp + 2                              # flattened-row halo needed per tile
    hs = _round_up(halo, 8)
    want_steps = 2 if B == 1 else 1                # keep both v7x cores busy when B==1
    tm = min(_round_up(tile_m, hs),
             _round_up(max(pl.cdiv(Lo, want_steps), 1), hs))
    tm = max(tm, hs)
    n_t = pl.cdiv(Lo, tm)
    ratio = tm // hs
    Lx = n_t * tm + hs                             # halo of the last tile fits in-bounds

    xf = x.reshape(B, Hp * Wp, Cin)
    xf = jnp.pad(xf, ((0, 0), (0, Lx - Hp * Wp), (0, 0)))

    shifts = tuple(r * Wp + c for r in range(3) for c in range(3))
    # (Cout, Cin, 3, 3) -> (3, 3, Cin, Cout) -> (9*Cin, Cout), matching im2col order.
    w_mat = jnp.transpose(w, (2, 3, 1, 0)).reshape(9 * Cin, Cout).astype(jnp.bfloat16)
    b2 = b.reshape(1, Cout).astype(jnp.float32)

    def cur_map(bb, t):
        return (bb, t, 0)

    def halo_map(bb, t):
        return (bb, (t + 1) * ratio, 0)

    def const_map(bb, t):
        return (0, 0)

    kernel = functools.partial(_conv_kstack_kernel, shifts=shifts, tile_m=tm)
    flops = int(2 * B * n_t * tm * 9 * Cin * Cout)
    bytes_acc = int(B * (Lx + n_t * hs) * Cin * 2 + 9 * Cin * Cout * 2
                    + B * n_t * tm * Cout * 2)

    out = pl.pallas_call(
        kernel,
        out_shape=jax.ShapeDtypeStruct((B, n_t * tm, Cout), jnp.bfloat16),
        grid=(B, n_t),
        in_specs=[
            pl.BlockSpec((1, tm, Cin), cur_map),        # current tile
            pl.BlockSpec((1, hs, Cin), halo_map),       # small row halo
            pl.BlockSpec((9 * Cin, Cout), const_map),   # resident weights
            pl.BlockSpec((1, Cout), const_map),         # bias
        ],
        out_specs=pl.BlockSpec((1, tm, Cout), cur_map),
        compiler_params=pltpu.CompilerParams(
            dimension_semantics=("parallel", "parallel"),
            vmem_limit_bytes=_vmem_limit_bytes(),
        ),
        cost_estimate=pl.CostEstimate(
            flops=flops, transcendentals=0, bytes_accessed=bytes_acc),
    )(xf, xf, w_mat, b2)

    out = out[:, :Lo, :].reshape(B, Ho, Wp, Cout)[:, :, :Wo, :]
    return out


# ----------------------------------------------------------------------------
# MaxPool2d(kernel, stride=2, ceil_mode=True) on NHWC — fully in-kernel
# ----------------------------------------------------------------------------
def _maxpool_kernel(*refs, k, tp, wo):
    if k == 3:
        x_ref, h_ref, o_ref, col_ref = refs
    else:
        x_ref, o_ref, col_ref = refs
        h_ref = None
    rows = x_ref[0].astype(jnp.float32)                       # (2*tp, Wp, C)
    wp, c = rows.shape[1], rows.shape[2]

    # Pool along H (outer dim): pairwise max via a free outer-dim reshape.
    hmax = jnp.max(rows.reshape(tp, 2, wp, c), axis=1)        # rows 2j and 2j+1
    if k == 3:
        rows_ext = jnp.concatenate(
            [rows, h_ref[0].astype(jnp.float32)], axis=0)     # (2*tp + 1, Wp, C)
        third = rows_ext[2:2 * tp + 2].reshape(tp, 2, wp, c)[:, 0]   # rows 2j+2
        hmax = jnp.maximum(hmax, third)

    # Pool along W: stride-2 loads from an f32 VMEM scratch (k column taps).
    col_ref[...] = hmax                                       # (tp, Wp, C)
    out = col_ref[:, pl.ds(0, wo, stride=2), :]
    for s in range(1, k):
        out = jnp.maximum(out, col_ref[:, pl.ds(s, wo, stride=2), :])
    o_ref[0] = out.astype(o_ref.dtype)


def maxpool2d_ceil_nhwc(x, kernel_size, stride=2, *, tile_rows=128):
    """MaxPool2d(kernel_size, stride=2, padding=0, ceil_mode=True) on (B,H,W,C)."""
    B, H, W, C = x.shape
    k, s = int(kernel_size), int(stride)
    assert s == 2 and k in (2, 3), "VGG front-end uses kernel in {2,3}, stride 2"
    Ho = -(-(H - k) // s) + 1
    Wo = -(-(W - k) // s) + 1
    Wp = (Wo - 1) * s + k

    tp = max(1, min(tile_rows, Ho))
    if B == 1:                                  # >=2 parallel steps for v7x megacore
        tp = max(1, min(tp, -(-Ho // 2)))
    n_t = pl.cdiv(Ho, tp)
    rows_main = s * tp
    Hp_pad = n_t * rows_main + (k - s)          # +1 extra halo row when k == 3

    xp = jnp.pad(x, ((0, 0), (0, Hp_pad - H), (0, Wp - W), (0, 0)),
                 constant_values=-jnp.inf)

    def main_map(bb, t):
        return (bb, t, 0, 0)

    in_specs = [pl.BlockSpec((1, rows_main, Wp, C), main_map)]
    args = [xp]
    if k == 3:
        def halo_map(bb, t):
            return (bb, (t + 1) * rows_main, 0, 0)
        in_specs.append(pl.BlockSpec((1, 1, Wp, C), halo_map))
        args.append(xp)

    kernel = functools.partial(_maxpool_kernel, k=k, tp=tp, wo=Wo)
    out = pl.pallas_call(
        kernel,
        out_shape=jax.ShapeDtypeStruct((B, n_t * tp, Wo, C), x.dtype),
        grid=(B, n_t),
        in_specs=in_specs,
        out_specs=pl.BlockSpec((1, tp, Wo, C), main_map),
        scratch_shapes=[pltpu.VMEM((tp, Wp, C), jnp.float32)],
        compiler_params=pltpu.CompilerParams(
            dimension_semantics=("parallel", "parallel"),
            vmem_limit_bytes=_vmem_limit_bytes(),
        ),
    )(*args)
    return out[:, :Ho]


# ----------------------------------------------------------------------------
# Tiled matmul + bias (final Linear), N padded to a multiple of 128 (lane-dense)
# ----------------------------------------------------------------------------
def _matmul_bias_kernel(x_ref, w_ref, b_ref, o_ref):
    acc = jnp.dot(x_ref[...], w_ref[...], preferred_element_type=jnp.float32)
    o_ref[...] = (acc + b_ref[...]).astype(o_ref.dtype)


def matmul_bias(x, w, b, *, out_dtype=jnp.float32, tile_m=1024):
    """x: (M, K) bf16; w: (K, N) bf16; b: (N,) f32 -> (M, N) out_dtype."""
    M, K = x.shape
    N = w.shape[1]
    Np = _round_up(N, 128)
    tm = _round_up(min(tile_m, max(pl.cdiv(M, 2), 8)), 8)
    Mp = _round_up(M, tm)
    n_m = Mp // tm

    xp = jnp.pad(x, ((0, Mp - M), (0, 0)))
    wp = jnp.pad(w, ((0, 0), (0, Np - N)))
    bp = jnp.pad(b.astype(jnp.float32), (0, Np - N)).reshape(1, Np)

    out = pl.pallas_call(
        _matmul_bias_kernel,
        out_shape=jax.ShapeDtypeStruct((Mp, Np), out_dtype),
        grid=(n_m,),
        in_specs=[
            pl.BlockSpec((tm, K), lambda i: (i, 0)),
            pl.BlockSpec((K, Np), lambda i: (0, 0)),
            pl.BlockSpec((1, Np), lambda i: (0, 0)),
        ],
        out_specs=pl.BlockSpec((tm, Np), lambda i: (i, 0)),
        compiler_params=pltpu.CompilerParams(
            dimension_semantics=("parallel",),
            vmem_limit_bytes=_vmem_limit_bytes(),
        ),
        cost_estimate=pl.CostEstimate(
            flops=int(2 * Mp * K * Np), transcendentals=0,
            bytes_accessed=int(Mp * K * 2 + K * Np * 2 + Mp * Np * 4)),
    )(xp, wp, bp)
    return out[:M, :N]


# ----------------------------------------------------------------------------
# ConvInput module (vgg_like=True)
# ----------------------------------------------------------------------------
def _init_conv_params(key, cout, cin, kh, kw):
    fan_in = cin * kh * kw
    bound = 1.0 / (fan_in ** 0.5)
    k1, k2 = jax.random.split(key)
    w = jax.random.uniform(k1, (cout, cin, kh, kw), jnp.float32, -bound, bound)
    b = jax.random.uniform(k2, (cout,), jnp.float32, -bound, bound)
    return w, b


class ConvInputPallas:
    def __init__(self, key, input_size, conv_size, subsampling_factor=4,
                 vgg_like=True, output_size=None):
        assert vgg_like, "only the VGG-like branch is implemented"
        c1, c2 = conv_size
        self.subsampling_factor = subsampling_factor
        self.maxpool_kernel1 = subsampling_factor // 2
        self.min_frame_length = 7 if subsampling_factor < 6 else 11

        # feature-width geometry through the stack
        f = input_size                                   # conv1 pad=1
        f = f - 2                                        # conv2 pad=0
        f = -(-(f - self.maxpool_kernel1) // 2) + 1      # maxpool1 (ceil)
        f = f                                            # conv3 pad=1
        f = f - 2                                        # conv4 pad=0
        f = -(-(f - 2) // 2) + 1                         # maxpool2 (ceil)
        output_proj = c2 * f

        keys = jax.random.split(key, 5)
        self.w1, self.b1 = _init_conv_params(keys[0], c1, 1, 3, 3)
        self.w2, self.b2 = _init_conv_params(keys[1], c1, c1, 3, 3)
        self.w3, self.b3 = _init_conv_params(keys[2], c2, c1, 3, 3)
        self.w4, self.b4 = _init_conv_params(keys[3], c2, c2, 3, 3)

        if output_size is not None:
            bound = 1.0 / (output_proj ** 0.5)
            ka, kb = jax.random.split(keys[4])
            # stored as (in, out) for the matmul kernel (PyTorch stores (out, in))
            self.out_w = jax.random.uniform(
                ka, (output_proj, output_size), jnp.float32, -bound, bound)
            self.out_b = jax.random.uniform(
                kb, (output_size,), jnp.float32, -bound, bound)
            self.output_size = output_size
        else:
            self.out_w = None
            self.out_b = None
            self.output_size = output_proj

    def __call__(self, x, mask=None):
        # x: (B, T, D_feats) -> NHWC (B, T, D, 1); bf16 activations in the stack.
        x = x[:, :, :, None].astype(jnp.bfloat16)
        x = conv3x3_relu_nhwc(x, self.w1, self.b1, padding=1)
        x = conv3x3_relu_nhwc(x, self.w2, self.b2, padding=0)
        x = maxpool2d_ceil_nhwc(x, self.maxpool_kernel1, 2)
        x = conv3x3_relu_nhwc(x, self.w3, self.b3, padding=1)
        x = conv3x3_relu_nhwc(x, self.w4, self.b4, padding=0)
        x = maxpool2d_ceil_nhwc(x, 2, 2)
        b, t, f, c = x.shape
        # match PyTorch NCHW transpose(1,2).view(b, t, c*f): channel-major flatten
        x = x.transpose(0, 1, 3, 2).reshape(b, t, c * f)
        if self.out_w is not None:
            y = matmul_bias(
                x.reshape(b * t, c * f),
                self.out_w.astype(jnp.bfloat16),
                self.out_b,
                out_dtype=jnp.float32,
            )
            x = y.reshape(b, t, self.output_size)
        else:
            x = x.astype(jnp.float32)
        if mask is not None:
            mask = mask[:, : x.shape[1]]  # replicate PyTorch slicing exactly
        return x, mask


# ----------------------------------------------------------------------------
# Pure-JAX f32 reference (for correctness check)
# ----------------------------------------------------------------------------
def _ref_conv(x, w, b, padding):
    out = jax.lax.conv_general_dilated(
        x, w, window_strides=(1, 1),
        padding=[(padding, padding), (padding, padding)],
        dimension_numbers=("NCHW", "OIHW", "NCHW"))
    return jax.nn.relu(out + b[None, :, None, None])


def _ref_pool(x, k, s=2):
    B, C, H, W = x.shape
    Ho = -(-(H - k) // s) + 1
    Wo = -(-(W - k) // s) + 1
    Hp = (Ho - 1) * s + k
    Wp = (Wo - 1) * s + k
    xp = jnp.pad(x, ((0, 0), (0, 0), (0, Hp - H), (0, Wp - W)),
                 constant_values=-jnp.inf)
    return jax.lax.reduce_window(xp, -jnp.inf, jax.lax.max,
                                 (1, 1, k, k), (1, 1, s, s), "VALID")


def reference_forward(m, x):
    x = x[:, None, :, :]
    x = _ref_conv(x, m.w1, m.b1, 1)
    x = _ref_conv(x, m.w2, m.b2, 0)
    x = _ref_pool(x, m.maxpool_kernel1)
    x = _ref_conv(x, m.w3, m.b3, 1)
    x = _ref_conv(x, m.w4, m.b4, 0)
    x = _ref_pool(x, 2)
    b, c, t, f = x.shape
    x = x.transpose(0, 2, 1, 3).reshape(b, t, c * f)
    if m.out_w is not None:
        x = x @ m.out_w + m.out_b
    return x


# ----------------------------------------------------------------------------
if __name__ == "__main__":
    key = jax.random.PRNGKey(0)
    k_x, k_params = jax.random.split(key)

    B, T, D = 2, 16, 16
    conv_size = (4, 8)
    output_size = 32

    x = jax.random.normal(k_x, (B, T, D), dtype=jnp.float32)
    mask = jnp.ones((B, 1, T), dtype=bool)

    model = ConvInputPallas(k_params, input_size=D, conv_size=conv_size,
                            subsampling_factor=4, vgg_like=True,
                            output_size=output_size)

    y, out_mask = model(x, mask)
    y = jax.block_until_ready(y)

    # correctness check against a pure-JAX f32 reference (bf16 MXU => loose tol)
    y_ref = reference_forward(model, x)
    assert y.shape == (B, 3, output_size), y.shape
    assert out_mask.shape[0] == B
    max_err = float(jnp.max(jnp.abs(y - y_ref)))
    assert jnp.allclose(y, y_ref, atol=5e-2, rtol=5e-2), f"max_err={max_err}"

    print("KERNEL_OK")
</pallas_src>

<mosaic_0001>
module attributes {stable_mosaic.version = 11 : i64} {
  func.func @_conv_kstack_kernel(%arg0: i32, %arg1: i32, %arg2: memref<1x320x1xbf16, #tpu.memory_space<vmem>>, %arg3: memref<1x40x1xbf16, #tpu.memory_space<vmem>>, %arg4: memref<9x4xbf16, #tpu.memory_space<vmem>>, %arg5: memref<1x4xf32, #tpu.memory_space<vmem>>, %arg6: memref<1x320x4xbf16, #tpu.memory_space<vmem>>) attributes {dimension_semantics = [#tpu.dimension_semantics<parallel>, #tpu.dimension_semantics<parallel>], iteration_bounds = array<i64: 2, 1>, scalar_prefetch = 0 : i64, scratch_operands = 0 : i64, tpu.core_type = #tpu.core_type<tc>, window_params = [{transform_indices = @transform_0, window_bounds = array<i64: 1, 320, 1>}, {transform_indices = @transform_1, window_bounds = array<i64: 1, 40, 1>}, {pipeline_mode = #tpu.pipeline_mode<synchronous>, transform_indices = @transform_2, window_bounds = array<i64: 9, 4>}, {pipeline_mode = #tpu.pipeline_mode<synchronous>, transform_indices = @transform_3, window_bounds = array<i64: 1, 4>}, {transform_indices = @transform_4, window_bounds = array<i64: 1, 320, 4>}]} {
    %c0 = arith.constant 0 : index
    %c0_0 = arith.constant 0 : index
    %c0_1 = arith.constant 0 : index
    %0 = vector.load %arg2[%c0, %c0_0, %c0_1] : memref<1x320x1xbf16, #tpu.memory_space<vmem>>, vector<1x320x1xbf16>
    %1 = vector.shape_cast %0 : vector<1x320x1xbf16> to vector<320x1xbf16>
    %c0_2 = arith.constant 0 : index
    %c0_3 = arith.constant 0 : index
    %c0_4 = arith.constant 0 : index
    %2 = vector.load %arg3[%c0_2, %c0_3, %c0_4] : memref<1x40x1xbf16, #tpu.memory_space<vmem>>, vector<1x40x1xbf16>
    %3 = vector.shape_cast %2 : vector<1x40x1xbf16> to vector<40x1xbf16>
    %4 = tpu.concatenate %1, %3 in 0 : vector<320x1xbf16>, vector<40x1xbf16> -> vector<360x1xbf16>
    %5 = vector.extract_strided_slice %4 {offsets = [0, 0], sizes = [320, 1], strides = [1, 1]} : vector<360x1xbf16> to vector<320x1xbf16>
    %6 = vector.extract_strided_slice %4 {offsets = [1, 0], sizes = [320, 1], strides = [1, 1]} : vector<360x1xbf16> to vector<320x1xbf16>
    %7 = vector.extract_strided_slice %4 {offsets = [2, 0], sizes = [320, 1], strides = [1, 1]} : vector<360x1xbf16> to vector<320x1xbf16>
    %8 = vector.extract_strided_slice %4 {offsets = [18, 0], sizes = [320, 1], strides = [1, 1]} : vector<360x1xbf16> to vector<320x1xbf16>
    %9 = vector.extract_strided_slice %4 {offsets = [19, 0], sizes = [320, 1], strides = [1, 1]} : vector<360x1xbf16> to vector<320x1xbf16>
    %10 = vector.extract_strided_slice %4 {offsets = [20, 0], sizes = [320, 1], strides = [1, 1]} : vector<360x1xbf16> to vector<320x1xbf16>
    %11 = vector.extract_strided_slice %4 {offsets = [36, 0], sizes = [320, 1], strides = [1, 1]} : vector<360x1xbf16> to vector<320x1xbf16>
    %12 = vector.extract_strided_slice %4 {offsets = [37, 0], sizes = [320, 1], strides = [1, 1]} : vector<360x1xbf16> to vector<320x1xbf16>
    %13 = vector.extract_strided_slice %4 {offsets = [38, 0], sizes = [320, 1], strides = [1, 1]} : vector<360x1xbf16> to vector<320x1xbf16>
    %14 = tpu.concatenate %5, %6, %7, %8, %9, %10, %11, %12, %13 in 1 : vector<320x1xbf16>, vector<320x1xbf16>, vector<320x1xbf16>, vector<320x1xbf16>, vector<320x1xbf16>, vector<320x1xbf16>, vector<320x1xbf16>, vector<320x1xbf16>, vector<320x1xbf16> -> vector<320x9xbf16>
    %c0_5 = arith.constant 0 : index
    %c0_6 = arith.constant 0 : index
    %15 = vector.load %arg4[%c0_5, %c0_6] : memref<9x4xbf16, #tpu.memory_space<vmem>>, vector<9x4xbf16>
    %cst = arith.constant dense<0.000000e+00> : vector<320x4xf32>
    %16 = tpu.matmul %14, %15, %cst {dimension_numbers = #tpu.dot_dimension_numbers<[1], [0], [0], [1], [0, 0, 1, 1], [], []>} : vector<320x9xbf16>, vector<9x4xbf16>, vector<320x4xf32> -> vector<320x4xf32>
    %c0_7 = arith.constant 0 : index
    %c0_8 = arith.constant 0 : index
    %17 = vector.load %arg5[%c0_7, %c0_8] : memref<1x4xf32, #tpu.memory_space<vmem>>, vector<1x4xf32>
    %18 = vector.broadcast %17 : vector<1x4xf32> to vector<320x4xf32>
    %19 = arith.addf %16, %18 : vector<320x4xf32>
    %cst_9 = arith.constant 0.000000e+00 : f32
    %20 = vector.broadcast %cst_9 : f32 to vector<320x4xf32>
    %21 = arith.maximumf %19, %20 : vector<320x4xf32>
    %22 = arith.truncf %21 : vector<320x4xf32> to vector<320x4xbf16>
    %c0_10 = arith.constant 0 : index
    %c0_11 = arith.constant 0 : index
    %c0_12 = arith.constant 0 : index
    %23 = vector.load %arg6[%c0_10, %c0_11, %c0_12] : memref<1x320x4xbf16, #tpu.memory_space<vmem>>, vector<1x320x4xbf16>
    %24 = vector.shape_cast %23 : vector<1x320x4xbf16> to vector<320x4xbf16>
    %25 = vector.shape_cast %22 : vector<320x4xbf16> to vector<1x320x4xbf16>
    tpu.vector_store %arg6[%c0_10, %c0_11, %c0_12], %25 {strides = array<i32>} : memref<1x320x4xbf16, #tpu.memory_space<vmem>>, vector<1x320x4xbf16>,
    return
  }
  func.func @transform_0(%arg0: i32, %arg1: i32) -> (i32, i32, i32) {
    %c0_i32 = arith.constant 0 : i32
    %c0_i32_0 = arith.constant 0 : i32
    return %arg0, %arg1, %c0_i32 : i32, i32, i32
  }
  func.func @transform_1(%arg0: i32, %arg1: i32) -> (i32, i32, i32) {
    %c1_i32 = arith.constant 1 : i32
    %0 = arith.addi %arg1, %c1_i32 : i32
    %c8_i32 = arith.constant 8 : i32
    %1 = arith.muli %0, %c8_i32 : i32
    %c0_i32 = arith.constant 0 : i32
    %c0_i32_0 = arith.constant 0 : i32
    return %arg0, %1, %c0_i32 : i32, i32, i32
  }
  func.func @transform_2(%arg0: i32, %arg1: i32) -> (i32, i32) {
    %c0_i32 = arith.constant 0 : i32
    %c0_i32_0 = arith.constant 0 : i32
    %c0_i32_1 = arith.constant 0 : i32
    return %c0_i32, %c0_i32_0 : i32, i32
  }
  func.func @transform_3(%arg0: i32, %arg1: i32) -> (i32, i32) {
    %c0_i32 = arith.constant 0 : i32
    %c0_i32_0 = arith.constant 0 : i32
    %c0_i32_1 = arith.constant 0 : i32
    return %c0_i32, %c0_i32_0 : i32, i32
  }
  func.func @transform_4(%arg0: i32, %arg1: i32) -> (i32, i32, i32) {
    %c0_i32 = arith.constant 0 : i32
    %c0_i32_0 = arith.constant 0 : i32
    return %arg0, %arg1, %c0_i32 : i32, i32, i32
  }
}

</mosaic_0001>

<bundles_post_ra>
// kernel: tpu_custom_call.1
= control target key start
LH: loop header
LB: loop body
LE: loop exit
PB: predicated region body
PF: predicated region fallthrough
CT: control target
= control target key end

     0   :  { %s2238_s15 = smov 0   ;;  %s2240_s16 = smov 0   ;;  %s3830_s0 = inlined_call_operand.vmem [shape: bf16[2,360,1], index: 0, kind: input, shape index: {}]   ;;  %s3831_s1 = inlined_call_operand.vmem [shape: bf16[2,360,1], index: 1, kind: input, shape index: {}]   ;;  %s3832_s2 = inlined_call_operand.vmem [shape: bf16[9,4], index: 2, kind: input, shape index: {}]   ;;  %s3833_s3 = inlined_call_operand.vmem [shape: f32[1,4], index: 3, kind: input, shape index: {}]   ;;  %s3834_s4 = inlined_call_operand.vmem [shape: bf16[2,320,4], index: 4, kind: output, shape index: {}]  }
   0x1   :  { %s2242_s17 = smov 0  }
   0x2 LB: > { %s26_s18 = sadd.s32 1, %s2198_s16  ;;  %p1987_p0 = scmp.ge.s32.totalorder %s2202_s17, 1  ;;  %s2202_s17 = sphi %s2242_s17, %s14_s17   ;;  %s2198_s16 = sphi %s2240_s16, %s4033_s16   ;;  %s2194_s15 = sphi %s2238_s15, %s4032_s15  }
   0x3   : > { %p28_p1 = scmp.ge.s32.totalorder %s26_s18, 2  ;;  %p216_p2 = scmp.lt.s32.totalorder %s2202_s17, 3 }
   0x5   : > { %s4035_s18 = smov (%p28_p1, %s26_s18), 0  ;;  %p217_p3 = pnand %p1987_p0, %p216_p2 }
   0x7   : > { %220 = sbr.rel (%p217_p3) target bundleno = 709 (0x2c5), region = 36 }
   0xc   : > { %p270_p4 = scmp.lt.s32.totalorder %s2194_s15, 1  ;;  %vm466_vm0 = vsmask.f32 7424  ;;  %s2204_s23 = smov 1   ;;  %vm671_vm1 = vcmask 1046528   ;;  %vm1261_vm3 = vcmask 7168  }
   0xd   : > { %s2205_s28 = smov 2   ;;  %s2206_s29 = smov 3   ;;  %vm795_vm2 = vsmask.f32 6400  ;;  %vm1302_vm4 = vcmask 15360   ;;  %vm1343_vm5 = vcmask 23552  }
   0xe   : > { %s4037_s15 = smov (!%p270_p4, %s2194_s15), 1  ;;  %s2207_s30 = smov 4   ;;  %vm926_vm6 = vcmask 1045504   ;;  %vm1050_vm7 = vsmask.f32 5376  ;;  %vm1179_vm8 = vcmask 1044480  }
   0xf   : > { %s2133_s19 = smul.u32 180, %s4037_s15  ;;  %s2208_s5 = smov 5   ;;  %vm1384_vm9 = vcmask 31744   ;;  %vm1641_vm10 = vcmask 1043456   ;;  %vm1425_vm11 = vcmask 39936   ;;  %vm1466_vm12 = vcmask 48128  }
  0x10   : > { %s2209_s6 = smov 6   ;;  %s2210_s7 = smov 7   ;;  %vm1507_vm13 = vcmask 56320   ;;  %vm1548_vm14 = vcmask 64512   ;;  %vm1600_vm15 = vcmask 72704  }
  0x11   : > { %s2264_s22 = scalar_lea.vmem %s3830_s0, %s2133_s19  ;;  %s2106_s24 = sadd.s32 160, %s2133_s19 }
  0x12   : > { %v2267_v0 = vld [vmem:[%s2264_s22 + $0x20] sm:$0xff]  ;;  %v2270_v1 = vld [vmem:[%s2264_s22 + $0x28] sm:$0xff]  ;;  %v2273_v2 = vld [vmem:[%s2264_s22 + $0x10] sm:$0xff]  ;;  %s2494_s27 = scalar_lea.vmem %s3831_s1, %s2106_s24  ;;  %s2211_s8 = smov 8  }
  0x13   : > { %3906 = vst [vmem:[#allocation2_spill] sm:$0xff] %v2270_v1  ;;  %v2276_v3 = vld [vmem:[%s2264_s22 + $0x18] sm:$0xff]  ;;  %v2279_v4 = vld [vmem:[%s2264_s22] sm:$0xff]  ;;  %v2282_v5 = vld [vmem:[%s2264_s22 + $0x8] sm:$0xff]  ;;  %v2285_v6 = vshll.u32 %v2267_v0, 16  ;;  %v2288_v7 = vshrl.u32 %v2267_v0, 16 }
  0x14   : > { %3907 = vst [vmem:[#allocation3_spill] sm:$0xff] %v2273_v2  ;;  %v2291_v8 = vshll.u32 %v2270_v1, 16  ;;  %v2294_v9 = vshll.u32 %v2273_v2, 16  ;;  %v2297_v10 = vld [vmem:[%s2264_s22 + $0x30] sm:$0xff]  ;;  %v2300_v11 = vshrl.u32 %v2273_v2, 16  ;;  %v2303_v12 = vshll.u32 %v2276_v3, 16 }
  0x15   : > { %3908 = vst [vmem:[#allocation4_spill] sm:$0xff] %v2276_v3  ;;  %v468_v13 = vshrl.u32 %v2279_v4, 16  ;;  %v470_v14 = vshll.u32 %v2279_v4, 16  ;;  %v501_v15 = vrot.slane %v2285_v6, 1  ;;  %v3835_v18 = vshll.u32 %v2282_v5, 16  ;;  %v2326_v27 = vld [vmem:[%s2264_s22 + $0x40] sm:$0xff] }
  0x16   : > { %3909 = vst [vmem:[#allocation5_spill] sm:$0xff] %v2279_v4  ;;  %v509_v16 = vrot.slane %v2291_v8, 1  ;;  %v485_v17 = vrot.slane %v2294_v9, 1  ;;  %v493_v19 = vrot.slane %v2303_v12, 1  ;;  %v2313_v21 = vshrl.u32 %v2270_v1, 16  ;;  %v2329_v28 = vld [vmem:[%s2264_s22 + $0x38] sm:$0xff] }
  0x17   : > { %3910 = vst [vmem:[#allocation6_spill] sm:$0xff] %v2285_v6  ;;  %v472_v20 = vrot.slane %v470_v14, 1  ;;  %v2316_v22 = vshll.u32 %v2297_v10, 16  ;;  %v505_v23 = vor.u32 %v2288_v7, %v501_v15  ;;  %v477_v25 = vrot.slane %v3835_v18, 1  ;;  %v2342_v37 = vld [vmem:[%s2264_s22 + $0x48] sm:$0xff]  ;;  %v2358_v44 = vld [vmem:[%s2264_s22 + $0x58] sm:$0xff] }
  0x18   : > { %3911 = vst [vmem:[#allocation7_spill] sm:$0xff] %v2288_v7  ;;  %v489_v24 = vor.u32 %v2300_v11, %v485_v17  ;;  %v2323_v26 = vshrl.u32 %v2276_v3, 16  ;;  %v3836_v30 = vshrl.u32 %v2282_v5, 16  ;;  %v513_v34 = vor.u32 %v2313_v21, %v509_v16  ;;  %v2369_v49 = vld [vmem:[%s2264_s22 + $0x50] sm:$0xff]  ;;  %v2378_v52 = vld [vmem:[%s2264_s22 + $0x60] sm:$0xff]  ;;  %s2135_s19 = smul.u32 160, %s4037_s15 }
  0x19   : > { %3912 = vst [vmem:[#allocation8_spill] sm:$0xff] %v2291_v8  ;;  %v473_v29 = vor.u32 %v472_v20, %v468_v13  ;;  %v510_v31 = vsel %vm466_vm0, %v505_v23, %v509_v16  ;;  %v517_v35 = vrot.slane %v2316_v22, 1  ;;  %v2345_v38 = vshll.u32 %v2326_v27, 16  ;;  %v2408_v16 = vld [vmem:[%s2264_s22 + $0x68] sm:$0xff] }
  0x1a   : > { %3913 = vst [vmem:[#allocation9_spill] sm:$0xff] %v2297_v10  ;;  %v494_v32 = vsel %vm466_vm0, %v489_v24, %v493_v19  ;;  %639 = vrot.lane.b32.xlu2 %v510_v31, %s2204_s23  ;;  %v497_v36 = vor.u32 %v2323_v26, %v493_v19  ;;  %v2348_v39 = vshll.u32 %v2329_v28, 16  ;;  %v481_v40 = vor.u32 %v3836_v30, %v477_v25  ;;  %v2419_v24 = vld [vmem:[%s2264_s22 + $0x78] sm:$0xff] }
  0x1b   : > { %3914 = vst [vmem:[#allocation10_spill] sm:$0xff] %v2313_v21  ;;  %635 = vrot.lane.b32.xlu1 %v494_v32, %s2204_s23  ;;  %v478_v33 = vsel %vm466_vm0, %v473_v29, %v477_v25  ;;  %v518_v41 = vsel %vm466_vm0, %v513_v34, %v517_v35  ;;  %v2355_v43 = vshrl.u32 %v2326_v27, 16  ;;  %v533_v45 = vrot.slane %v2345_v38, 1 }
  0x1c   : > { %3915 = vst [vmem:[#allocation11_spill] sm:$0xff] %v2316_v22  ;;  %631 = vrot.lane.b32.xlu0 %v478_v33, %s2204_s23  ;;  %v502_v42 = vsel %vm466_vm0, %v497_v36, %v501_v15  ;;  %v2362_v46 = vshll.u32 %v2342_v37, 16  ;;  %v525_v47 = vrot.slane %v2348_v39, 1  ;;  %v2366_v48 = vshrl.u32 %v2329_v28, 16  ;;  %v2405_v15 = vld [vmem:[%s2264_s22 + $0x70] sm:$0xff]  ;;  %v2438_v36 = vld [vmem:[%s2264_s22 + $0x88] sm:$0xff] }
  0x1d   : > { %3916 = vst [vmem:[#allocation12_spill] sm:$0xff] %v2326_v27  ;;  %v486_v50 = vsel %vm466_vm0, %v481_v40, %v485_v17  ;;  %v2373_v51 = vshrl.u32 %v2297_v10, 16  ;;  %v2381_v53 = vshll.u32 %v2358_v44, 16  ;;  %v537_v54 = vor.u32 %v2355_v43, %v533_v45 }
  0x1e   : > { %3917 = vst [vmem:[#allocation13_spill] sm:$0xff] %v2329_v28  ;;  %v541_v55 = vrot.slane %v2362_v46, 1  ;;  %v529_v56 = vor.u32 %v2366_v48, %v525_v47  ;;  %v2388_v57 = vshll.u32 %v2369_v49, 16  ;;  %v2393_v60 = vshrl.u32 %v2358_v44, 16 }
  0x1f   : > { %3918 = vst [vmem:[#allocation14_spill] sm:$0xff] %v2342_v37  ;;  %v521_v58 = vor.u32 %v2373_v51, %v517_v35  ;;  %v557_v59 = vrot.slane %v2381_v53, 1  ;;  %v2396_v61 = vshll.u32 %v2378_v52, 16  ;;  %v2402_v14 = vshrl.u32 %v2369_v49, 16 }
  0x20   : > { %3919 = vst [vmem:[#allocation15_spill] sm:$0xff] %v2369_v49  ;;  %v542_v62 = vsel %vm466_vm0, %v537_v54, %v541_v55  ;;  %v534_v63 = vsel %vm466_vm0, %v529_v56, %v533_v45  ;;  %v549_v13 = vrot.slane %v2388_v57, 1  ;;  %v2412_v19 = vshrl.u32 %v2342_v37, 16 }
  0x21   : > { %3920 = vst [vmem:[#allocation16_spill] sm:$0xff] %v2373_v51  ;;  %v526_v17 = vsel %vm466_vm0, %v521_v58, %v525_v47  ;;  %v561_v20 = vor.u32 %v2393_v60, %v557_v59  ;;  %v565_v23 = vrot.slane %v2396_v61, 1  ;;  %v2424_v29 = vshll.u32 %v2405_v15, 16  ;;  %v2447_v47 = vld [vmem:[%s2264_s22 + $0x80] sm:$0xff] }
  0x22   : > { %641 = vrot.lane.b32.xlu2 %v518_v41, %s2204_s23  ;;  %3921 = vst [vmem:[#allocation17_spill] sm:$0xff] %v2381_v53  ;;  %v553_v25 = vor.u32 %v2402_v14, %v549_v13  ;;  %v2427_v31 = vshll.u32 %v2408_v16, 16  ;;  %v545_v32 = vor.u32 %v2412_v19, %v541_v55  ;;  %v2432_v34 = vshrl.u32 %v2405_v15, 16  ;;  %v2456_v55 = vld [vmem:[%s2264_s22 + $0x90] sm:$0xff] }
  0x23   : > { %637 = vrot.lane.b32.xlu1 %v502_v42, %s2204_s23  ;;  %3922 = vst [vmem:[#allocation18_spill] sm:$0xff] %v2388_v57  ;;  %v566_v33 = vsel %vm466_vm0, %v561_v20, %v565_v23  ;;  %v2435_v35 = vshll.u32 %v2419_v24, 16  ;;  %v581_v41 = vrot.slane %v2424_v29, 1  ;;  %v2444_v45 = vshrl.u32 %v2408_v16, 16 }
  0x24   : > { %633 = vrot.lane.b32.xlu0 %v486_v50, %s2204_s23  ;;  %3923 = vst [vmem:[#allocation19_spill] sm:$0xff] %v2393_v60  ;;  %v558_v40 = vsel %vm466_vm0, %v553_v25, %v557_v59  ;;  %v573_v42 = vrot.slane %v2427_v31, 1  ;;  %v550_v50 = vsel %vm466_vm0, %v545_v32, %v549_v13  ;;  %v2451_v54 = vshrl.u32 %v2378_v52, 16 }
  0x25   : > { %3924 = vst [vmem:[#allocation20_spill] sm:$0xff] %v2402_v14  ;;  %v2459_v56 = vshll.u32 %v2438_v36, 16  ;;  %v585_v58 = vor.u32 %v2432_v34, %v581_v41  ;;  %v589_v59 = vrot.slane %v2435_v35, 1  ;;  %v2473_v20 = vshrl.u32 %v2438_v36, 16 }
  0x26   : > { %3925 = vst [vmem:[#allocation21_spill] sm:$0xff] %v2405_v15  ;;  %v569_v13 = vor.u32 %v2451_v54, %v565_v23  ;;  %v2476_v25 = vshll.u32 %v2456_v55, 16  ;;  %v2485_v23 = vld [vmem:[%s2264_s22 + $0x98] sm:$0xff]  ;;  %v2489_v30 = vshrl.u32 %v2419_v24, 16 }
  0x27   : > { %3926 = vst [vmem:[#allocation22_spill] sm:$0xff] %v2435_v35  ;;  %v590_v32 = vsel %vm466_vm0, %v585_v58, %v589_v59 }
  0x28   : > { %3927 = vst [vmem:[#allocation23_spill] sm:$0xff] %v2438_v36  ;;  %v574_v18 = vsel %vm466_vm0, %v569_v13, %v573_v42  ;;  %v613_v58 = vrot.slane %v2476_v25, 1  ;;  %v2506_v13 = vshll.u32 %v2485_v23, 16 }
  0x29   : > { %3928 = vst [vmem:[#allocation24_spill] sm:$0xff] %v2447_v47 }
  0x2a   : > { %647 = vrot.lane.b32.xlu2 %v542_v62, %s2204_s23  ;;  %3929 = vst [vmem:[#allocation25_spill] sm:$0xff] %v2459_v56  ;;  %v577_v62 = vor.u32 %v2444_v45, %v573_v42 }
  0x2b   : > { %645 = vrot.lane.b32.xlu1 %v534_v63, %s2204_s23  ;;  %v2466_v63 = vshll.u32 %v2447_v47, 16  ;;  %3931 = vst [vmem:[#allocation27_spill] sm:$0xff] %v2473_v20 }
  0x2c   : > { %643 = vrot.lane.b32.xlu0 %v526_v17, %s2204_s23  ;;  %v605_v17 = vrot.slane %v2459_v56, 1  ;;  %3932 = vst [vmem:[#allocation28_spill] sm:$0xff] %v2476_v25  ;;  %v593_v56 = vor.u32 %v2489_v30, %v589_v59 }
  0x2d   : > { %3930 = vst [vmem:[#allocation26_spill] sm:$0xff] %v2466_v63 }
  0x2e   : > { %3934 = vst [vmem:[#allocation30_spill] sm:$0xff] %v2485_v23 }
  0x2f   : > { %3935 = vst [vmem:[#allocation31_spill] sm:$0xff] %v2489_v30 }
  0x30   : > { %3937 = vst [vmem:[#allocation33_spill] sm:$0xff] %v2506_v13 }
  0x32   : > { %653 = vrot.lane.b32.xlu2 %v566_v33, %s2204_s23  ;;  %v582_v33 = vsel %vm466_vm0, %v577_v62, %v581_v41  ;;  %v609_v41 = vor.u32 %v2473_v20, %v605_v17  ;;  %v2503_v62 = vld [vmem:[%s2494_s27] sm:$0xff] }
  0x33   : > { %651 = vrot.lane.b32.xlu1 %v558_v40, %s2204_s23  ;;  %v597_v40 = vrot.slane %v2466_v63, 1  ;;  %3936 = vst [vmem:[#allocation32_spill] sm:$0xff] %v2503_v62  ;;  %v2510_v63 = vshrl.u32 %v2485_v23, 16  ;;  %v2516_v25 = vshll.u32 %v2503_v62, 16 }
  0x34   : > { %649 = vrot.lane.b32.xlu0 %v550_v50, %s2204_s23  ;;  %v2482_v50 = vshrl.u32 %v2447_v47, 16 }
  0x35   : > { %3938 = vst [vmem:[#allocation34_spill] sm:$0xff] %v2510_v63  ;;  %v598_v20 = vsel %vm466_vm0, %v593_v56, %v597_v40 }
  0x36   : > { %3933 = vst [vmem:[#allocation29_spill] sm:$0xff] %v2482_v50  ;;  %v601_v42 = vor.u32 %v2482_v50, %v597_v40  ;;  %v2520_v50 = vshrl.u32 %v2456_v55, 16 }
  0x37   : > { %3939 = vst [vmem:[#allocation35_spill] sm:$0xff] %v2516_v25 }
  0x38   : > { %3940 = vst [vmem:[#allocation36_spill] sm:$0xff] %v2520_v50  ;;  %v617_v56 = vor.u32 %v2520_v50, %v613_v58 }
  0x3a   : > { %659 = vrot.lane.b32.xlu2 %v590_v32, %s2204_s23  ;;  %v614_v32 = vsel %vm466_vm0, %v609_v41, %v613_v58  ;;  %v672_v41 = vrot.slane %v2279_v4, 1  ;;  %v703_v4 = vrot.slane %v2447_v47, 1 }
  0x3b   : > { %657 = vrot.lane.b32.xlu1 %v582_v33, %s2204_s23  ;;  %v621_v33 = vrot.slane %v2506_v13, 1 }
  0x3c   : > { %655 = vrot.lane.b32.xlu0 %v574_v18, %s2204_s23  ;;  %v606_v18 = vsel %vm466_vm0, %v601_v42, %v605_v17  ;;  %v629_v17 = vrot.slane %v2516_v25, 1  ;;  %v673_v42 = vrot.slane %v2282_v5, 1  ;;  %v679_v25 = vrot.slane %v2267_v0, 1 }
  0x3d   : > { %v625_v59 = vor.u32 %v2510_v63, %v621_v33 }
  0x3e   : > { %v674_v13 = vsel %vm671_vm1, %v672_v41, %v673_v42  ;;  %v685_v41 = vrot.slane %v2329_v28, 1 }
  0x3f   : > { %v630_v40 = vsel %vm466_vm0, %v625_v59, %v629_v17 }
  0x42   : > { %665 = vrot.lane.b32.xlu2 %v614_v32, %s2204_s23  ;;  %v622_v32 = vsel %vm466_vm0, %v617_v56, %v621_v33  ;;  %v683_v33 = vrot.slane %v2297_v10, 1  ;;  %v709_v10 = vrot.slane %v2485_v23, 1  ;;  %vm1837_vm0 = vcmask 27648  }
  0x43   : > { %663 = vrot.lane.b32.xlu1 %v606_v18, %s2204_s23  ;;  %v677_v18 = vrot.slane %v2276_v3, 1 }
  0x44   : > { %661 = vrot.lane.b32.xlu0 %v598_v20, %s2204_s23  ;;  %v675_v20 = vrot.slane %v2273_v2, 1 }
  0x45   : > { %v680_v59 = vsel %vm671_vm1, %v677_v18, %v679_v25 }
  0x46   : > { %v678_v58 = vsel %vm671_vm1, %v675_v20, %v677_v18  ;;  %v676_v17 = vsel %vm671_vm1, %v673_v42, %v675_v20  ;;  %v687_v42 = vrot.slane %v2326_v27, 1  ;;  %v689_v20 = vrot.slane %v2342_v37, 1 }
  0x47   : > { %v691_v18 = vrot.slane %v2369_v49, 1  ;;  %v697_v37 = vrot.slane %v2408_v16, 1 }
  0x48   : > { %v690_v63 = vsel %vm671_vm1, %v687_v42, %v689_v20 }
  0x4a   : > { %713 = vrot.lane.b32.xlu2 %v674_v13, %s2205_s28  ;;  %v681_v13 = vrot.slane %v2270_v1, 1  ;;  %v692_v1 = vsel %vm671_vm1, %v689_v20, %v691_v18 }
  0x4b   : > { %669 = vrot.lane.b32.xlu1 %v630_v40, %s2204_s23  ;;  %v686_v40 = vsel %vm671_vm1, %v683_v33, %v685_v41 }
  0x4c   : > { %667 = vrot.lane.b32.xlu0 %v622_v32, %s2204_s23  ;;  %v684_v56 = vsel %vm671_vm1, %v681_v13, %v683_v33  ;;  %v682_v32 = vsel %vm671_vm1, %v679_v25, %v681_v13  ;;  %v688_v33 = vsel %vm671_vm1, %v685_v41, %v687_v42  ;;  %v693_v25 = vrot.slane %v2358_v44, 1 }
  0x4d   : > { %v695_v13 = vrot.slane %v2378_v52, 1  ;;  %v699_v41 = vrot.slane %v2405_v15, 1  ;;  %v701_v42 = vrot.slane %v2419_v24, 1  ;;  %v711_v15 = vrot.slane %v2503_v62, 1 }
  0x4e   : > { %v694_v20 = vsel %vm671_vm1, %v691_v18, %v693_v25  ;;  %v705_v18 = vrot.slane %v2438_v36, 1 }
  0x4f   : > { %v696_v27 = vsel %vm671_vm1, %v693_v25, %v695_v13  ;;  %v698_v49 = vsel %vm671_vm1, %v695_v13, %v697_v37  ;;  %v702_v3 = vsel %vm671_vm1, %v699_v41, %v701_v42  ;;  %v704_v2 = vsel %vm671_vm1, %v701_v42, %v703_v4 }
  0x50   : > { %v700_v13 = vsel %vm671_vm1, %v697_v37, %v699_v41  ;;  %v707_v25 = vrot.slane %v2456_v55, 1  ;;  %v706_v37 = vsel %vm671_vm1, %v703_v4, %v705_v18  ;;  %v712_v23 = vsel %vm671_vm1, %v709_v10, %v711_v15 }
  0x52   : > { %719 = vrot.lane.b32.xlu2 %v680_v59, %s2205_s28  ;;  %v708_v50 = vsel %vm671_vm1, %v705_v18, %v707_v25  ;;  %v710_v42 = vsel %vm671_vm1, %v707_v25, %v709_v10 }
  0x53   : > { %717 = vrot.lane.b32.xlu1 %v678_v58, %s2205_s28 }
  0x54   : > { %715 = vrot.lane.b32.xlu0 %v676_v17, %s2205_s28 }
  0x5a   : > { %725 = vrot.lane.b32.xlu2 %v686_v40, %s2205_s28 }
  0x5b   : > { %723 = vrot.lane.b32.xlu1 %v684_v56, %s2205_s28 }
  0x5c   : > { %721 = vrot.lane.b32.xlu0 %v682_v32, %s2205_s28 }
  0x62   : > { %731 = vrot.lane.b32.xlu2 %v692_v1, %s2205_s28 }
  0x63   : > { %729 = vrot.lane.b32.xlu1 %v690_v63, %s2205_s28 }
  0x64   : > { %727 = vrot.lane.b32.xlu0 %v688_v33, %s2205_s28 }
  0x6a   : > { %737 = vrot.lane.b32.xlu2 %v698_v49, %s2205_s28 }
  0x6b   : > { %735 = vrot.lane.b32.xlu1 %v696_v27, %s2205_s28 }
  0x6c   : > { %733 = vrot.lane.b32.xlu0 %v694_v20, %s2205_s28 }
  0x72   : > { %743 = vrot.lane.b32.xlu2 %v704_v2, %s2205_s28 }
  0x73   : > { %741 = vrot.lane.b32.xlu1 %v702_v3, %s2205_s28 }
  0x74   : > { %739 = vrot.lane.b32.xlu0 %v700_v13, %s2205_s28  ;;  %v2584_v28 = vpop.permute.xlu2 %639 }
  0x7a   : > { %749 = vrot.lane.b32.xlu2 %v710_v42, %s2205_s28 }
  0x7b   : > { %747 = vrot.lane.b32.xlu1 %v708_v50, %s2205_s28 }
  0x7c   : > { %745 = vrot.lane.b32.xlu0 %v706_v37, %s2205_s28  ;;  %v2592_v41 = vpop.permute.xlu2 %641 }
  0x7d   : > { %3941 = vst [vmem:[#allocation37_spill] sm:$0xff] %v2592_v41 }
  0x82   : > { %757 = vrot.lane.b32.xlu2 %v678_v58, %s2206_s29 }
  0x83   : > { %755 = vrot.lane.b32.xlu1 %v676_v17, %s2206_s29 }
  0x84   : > { %751 = vrot.lane.b32.xlu0 %v712_v23, %s2205_s28  ;;  %v2599_v4 = vpop.permute.xlu2 %647 }
  0x85   : > { %3942 = vst [vmem:[#allocation38_spill] sm:$0xff] %v2599_v4  ;;  %v800_v4 = vrot.slane %v2294_v9, 2 }
  0x8a   : > { %763 = vrot.lane.b32.xlu2 %v684_v56, %s2206_s29 }
  0x8b   : > { %761 = vrot.lane.b32.xlu1 %v682_v32, %s2206_s29 }
  0x8c   : > { %759 = vrot.lane.b32.xlu0 %v680_v59, %s2206_s29  ;;  %v2604_v18 = vpop.permute.xlu2 %653 }
  0x8d   : > { %3943 = vst [vmem:[#allocation39_spill] sm:$0xff] %v2604_v18  ;;  %v2606_v25 = vpop.permute.xlu1 %635  ;;  %v799_v18 = vrot.slane %v2300_v11, 1 }
  0x8e   : > { %3944 = vst [vmem:[#allocation40_spill] sm:$0xff] %v2606_v25  ;;  %v2608_v10 = vpop.permute.xlu0 %631 }
  0x92   : > { %769 = vrot.lane.b32.xlu2 %v690_v63, %s2206_s29 }
  0x93   : > { %767 = vrot.lane.b32.xlu1 %v688_v33, %s2206_s29 }
  0x94   : > { %765 = vrot.lane.b32.xlu0 %v686_v40, %s2206_s29  ;;  %v2613_v58 = vpop.permute.xlu2 %659 }
  0x95   : > { %v2615_v17 = vpop.permute.xlu1 %637 }
  0x96   : > { %3945 = vst [vmem:[#allocation41_spill] sm:$0xff] %v2615_v17  ;;  %v2617_v56 = vpop.permute.xlu0 %633 }
  0x9a   : > { %775 = vrot.lane.b32.xlu2 %v696_v27, %s2206_s29  ;;  %v2638_v27 = vld [vmem:[%s2494_s27 + $0x8] sm:$0xff] }
  0x9b   : > { %773 = vrot.lane.b32.xlu1 %v694_v20, %s2206_s29  ;;  %3948 = vst [vmem:[#allocation44_spill] sm:$0xff] %v2638_v27 }
  0x9c   : > { %771 = vrot.lane.b32.xlu0 %v692_v1, %s2206_s29  ;;  %v2622_v59 = vpop.permute.xlu2 %665  ;;  %v753_v1 = vrot.slane %v2638_v27, 1  ;;  %v807_v27 = vrot.slane %v2288_v7, 1 }
  0x9d   : > { %v2624_v32 = vpop.permute.xlu1 %645 }
  0x9e   : > { %v2626_v63 = vpop.permute.xlu0 %643  ;;  %v754_v62 = vsel %vm671_vm1, %v711_v15, %v753_v1  ;;  %v801_v15 = vor.u32 %v800_v4, %v799_v18  ;;  %v820_v4 = vrot.slane %v2348_v39, 2 }
  0x9f   : > { %3946 = vst [vmem:[#allocation42_spill] sm:$0xff] %v2626_v63  ;;  %v3952_v63 = vshll.u32 %v2282_v5, 16 }
  0xa2   : > { %781 = vrot.lane.b32.xlu2 %v702_v3, %s2206_s29 }
  0xa3   : > { %779 = vrot.lane.b32.xlu1 %v700_v13, %s2206_s29 }
  0xa4   : > { %777 = vrot.lane.b32.xlu0 %v698_v49, %s2206_s29  ;;  %v2633_v33 = vpop.permute.xlu2 %713 }
  0xa5   : > { %v2631_v40 = vpop.permute.xlu1 %651 }
  0xa6   : > { %v2635_v20 = vpop.permute.xlu0 %649 }
  0xa7   : > { %3947 = vst [vmem:[#allocation43_spill] sm:$0xff] %v2635_v20  ;;  %v3951_v20 = vshrl.u32 %v2282_v5, 16 }
  0xa9   : > { %v796_v41 = vrot.slane %v3951_v20, 1  ;;  %v811_v20 = vrot.slane %v2313_v21, 1 }
  0xaa   : > { %787 = vrot.lane.b32.xlu2 %v708_v50, %s2206_s29  ;;  %v804_v50 = vrot.slane %v2303_v12, 2 }
  0xab   : > { %785 = vrot.lane.b32.xlu1 %v706_v37, %s2206_s29  ;;  %v803_v37 = vrot.slane %v2323_v26, 1 }
  0xac   : > { %783 = vrot.lane.b32.xlu0 %v704_v2, %s2206_s29  ;;  %v2646_v3 = vpop.permute.xlu2 %719  ;;  %v808_v2 = vrot.slane %v2285_v6, 2 }
  0xad   : > { %v2644_v13 = vpop.permute.xlu1 %657  ;;  %3949 = vst [vmem:[#allocation45_spill] sm:$0xff] %v2646_v3  ;;  %v805_v1 = vor.u32 %v804_v50, %v803_v37 }
  0xae   : > { %v2648_v49 = vpop.permute.xlu0 %655  ;;  %v809_v3 = vor.u32 %v808_v2, %v807_v27 }
  0xaf   : > { %3950 = vst [vmem:[#allocation46_spill] sm:$0xff] %v2648_v49  ;;  %v797_v49 = vrot.slane %v3952_v63, 2  ;;  %v812_v63 = vrot.slane %v2291_v8, 2  ;;  %v806_v18 = vsel %vm795_vm2, %v801_v15, %v805_v1 }
  0xb0   : > { %v810_v27 = vsel %vm795_vm2, %v805_v1, %v809_v3 }
  0xb1   : > { %v798_v6 = vor.u32 %v797_v49, %v796_v41  ;;  %v813_v41 = vor.u32 %v812_v63, %v811_v20  ;;  %v828_v20 = vrot.slane %v2362_v46, 2  ;;  %v831_v63 = vrot.slane %v2402_v14, 1 }
  0xb2   : > { %793 = vrot.lane.b32.xlu2 %v754_v62, %s2206_s29  ;;  %v816_v62 = vrot.slane %v2316_v22, 2  ;;  %v835_v14 = vrot.slane %v2393_v60, 1 }
  0xb3   : > { %791 = vrot.lane.b32.xlu1 %v712_v23, %s2206_s29  ;;  %v815_v23 = vrot.slane %v2373_v51, 1  ;;  %v802_v37 = vsel %vm795_vm2, %v798_v6, %v801_v15  ;;  %v823_v6 = vrot.slane %v2355_v43, 1  ;;  %v824_v15 = vrot.slane %v2345_v38, 2 }
  0xb4   : > { %789 = vrot.lane.b32.xlu0 %v710_v42, %s2206_s29  ;;  %v2666_v7 = vpop.permute.xlu2 %725  ;;  %v819_v42 = vrot.slane %v2366_v48, 1 }
  0xb5   : > { %v2664_v25 = vpop.permute.xlu1 %663  ;;  %v817_v49 = vor.u32 %v816_v62, %v815_v23  ;;  %v832_v23 = vrot.slane %v2388_v57, 2  ;;  %v814_v62 = vsel %vm795_vm2, %v809_v3, %v813_v41  ;;  %v836_v57 = vrot.slane %v2381_v53, 2 }
  0xb6   : > { %v662_v17 = vpop.permute.xlu0 %661  ;;  %v821_v50 = vor.u32 %v820_v4, %v819_v42  ;;  %v825_v42 = vor.u32 %v824_v15, %v823_v6  ;;  %v839_v3 = vrot.slane %v2451_v54, 1 }
  0xb7   : > { %v818_v8 = vsel %vm795_vm2, %v813_v41, %v817_v49  ;;  %v843_v41 = vrot.slane %v2444_v45, 1 }
  0xb8   : > { %v822_v1 = vsel %vm795_vm2, %v817_v49, %v821_v50 }
  0xba   : > { %890 = vrot.lane.b32.xlu2 %v810_v27, %s2207_s30  ;;  %v833_v27 = vor.u32 %v832_v23, %v831_v63 }
  0xbb   : > { %888 = vrot.lane.b32.xlu1 %v806_v18, %s2207_s30  ;;  %v827_v18 = vrot.slane %v2412_v19, 1 }
  0xbc   : > { %886 = vrot.lane.b32.xlu0 %v802_v37, %s2207_s30  ;;  %v2682_v22 = vpop.permute.xlu2 %731 }
  0xbd   : > { %v2680_v2 = vpop.permute.xlu1 %669  ;;  %v829_v4 = vor.u32 %v828_v20, %v827_v18  ;;  %v826_v18 = vsel %vm795_vm2, %v821_v50, %v825_v42  ;;  %v837_v20 = vor.u32 %v836_v57, %v835_v14  ;;  %v847_v14 = vrot.slane %v2432_v34, 1 }
  0xbe   : > { %v668_v51 = vpop.permute.xlu0 %667 }
  0xbf   : > { %v830_v6 = vsel %vm795_vm2, %v825_v42, %v829_v4  ;;  %v834_v15 = vsel %vm795_vm2, %v829_v4, %v833_v27 }
  0xc2   : > { %896 = vrot.lane.b32.xlu2 %v822_v1, %s2207_s30  ;;  %v844_v1 = vrot.slane %v2427_v31, 2 }
  0xc3   : > { %894 = vrot.lane.b32.xlu1 %v818_v8, %s2207_s30  ;;  %v840_v8 = vrot.slane %v2396_v61, 2 }
  0xc4   : > { %892 = vrot.lane.b32.xlu0 %v814_v62, %s2207_s30  ;;  %v2698_v49 = vpop.permute.xlu2 %737  ;;  %v845_v23 = vor.u32 %v844_v1, %v843_v41  ;;  %v1293_v62 = vsel %vm1261_vm3, %v2419_v24, %v662_v17  ;;  %v852_v41 = vrot.slane %v2435_v35, 2  ;;  %v3953_v24 = vld [vmem:[#allocation29_spill] sm:$0xff]  ;;  %v3954_v1 = vld [vmem:[#allocation26_spill] sm:$0xff] }
  0xc5   : > { %v2696_v37 = vpop.permute.xlu1 %717  ;;  %v841_v63 = vor.u32 %v840_v8, %v839_v3  ;;  %v848_v3 = vrot.slane %v2424_v29, 2  ;;  %v851_v8 = vrot.slane %v2489_v30, 1  ;;  %v855_v17 = vrot.slane %v3953_v24, 1 }
  0xc6   : > { %v716_v21 = vpop.permute.xlu0 %715 }
  0xc7   : > { %v842_v42 = vsel %vm795_vm2, %v837_v20, %v841_v63  ;;  %v846_v57 = vsel %vm795_vm2, %v841_v63, %v845_v23 }
  0xca   : > { %902 = vrot.lane.b32.xlu2 %v834_v15, %s2207_s30  ;;  %v849_v15 = vor.u32 %v848_v3, %v847_v14  ;;  %v3956_v3 = vld [vmem:[#allocation25_spill] sm:$0xff] }
  0xcb   : > { %900 = vrot.lane.b32.xlu1 %v830_v6, %s2207_s30  ;;  %v856_v6 = vrot.slane %v3954_v1, 2 }
  0xcc   : > { %898 = vrot.lane.b32.xlu0 %v826_v18, %s2207_s30  ;;  %v744_v60 = vpop.permute.xlu2 %743  ;;  %v853_v18 = vor.u32 %v852_v41, %v851_v8  ;;  %v860_v8 = vrot.slane %v3956_v3, 2  ;;  %v3890_v41 = vrot.slane %v2447_v47, 2 }
  0xcd   : > { %v2714_v53 = vpop.permute.xlu1 %723  ;;  %v2717_v4 = vsel %vm1302_vm4, %v1293_v62, %v744_v60  ;;  %v838_v60 = vsel %vm795_vm2, %v833_v27, %v837_v20  ;;  %v857_v63 = vor.u32 %v856_v6, %v855_v17  ;;  %v1299_v62 = vsel %vm1261_vm3, %v2456_v55, %v668_v51 }
  0xce   : > { %v722_v50 = vpop.permute.xlu0 %721  ;;  %v854_v27 = vsel %vm795_vm2, %v849_v15, %v853_v18  ;;  %v3889_v51 = vrot.slane %v2358_v44, 2  ;;  %v958_v17 = vrot.slane %v2438_v36, 2 }
  0xcf   : > { %v858_v20 = vsel %vm795_vm2, %v853_v18, %v857_v63 }
  0xd2   : > { %908 = vrot.lane.b32.xlu2 %v846_v57, %s2207_s30  ;;  %v3955_v57 = vld [vmem:[#allocation27_spill] sm:$0xff] }
  0xd3   : > { %906 = vrot.lane.b32.xlu1 %v842_v42, %s2207_s30  ;;  %v850_v42 = vsel %vm795_vm2, %v845_v23, %v849_v15  ;;  %v859_v14 = vrot.slane %v3955_v57, 1  ;;  %v1265_v23 = vsel %vm1261_vm3, %v2282_v5, %v2617_v56  ;;  %v2773_v56 = vsel %vm926_vm6, %v3890_v41, %v958_v17 }
  0xd4   : > { %904 = vrot.lane.b32.xlu0 %v838_v60, %s2207_s30  ;;  %v750_v35 = vpop.permute.xlu2 %749  ;;  %v1306_v6 = vsel %vm1302_vm4, %v1265_v23, %v716_v21  ;;  %3958 = vst [vmem:[#allocation25_spill] sm:$0xff] %v2773_v56  ;;  %v1090_v21 = vrot.slane %v2451_v54, 2  ;;  %v3892_v54 = vrot.slane %v2408_v16, 2 }
  0xd5   : > { %v2733_v30 = vpop.permute.xlu1 %729  ;;  %v2736_v24 = vsel %vm1302_vm4, %v1299_v62, %v750_v35  ;;  %v948_v35 = vrot.slane %v2378_v52, 2  ;;  %v2758_v18 = vor.u32 %v860_v8, %v859_v14  ;;  %v1094_v14 = vrot.slane %v2444_v45, 2 }
  0xd6   : > { %v2738_v1 = vpop.permute.xlu0 %727  ;;  %v1095_v8 = vrot.slane %v2427_v31, 3 }
  0xd7   : > { %v862_v23 = vsel %vm795_vm2, %v857_v63, %v2758_v18  ;;  %v3960_v63 = vld [vmem:[#allocation21_spill] sm:$0xff] }
  0xd8   : > { %v2792_v31 = vor.u32 %v1095_v8, %v1094_v14 }
  0xda   : > { %914 = vrot.lane.b32.xlu2 %v858_v20, %s2207_s30  ;;  %v2768_v20 = vsel %vm926_vm6, %v3889_v51, %v948_v35 }
  0xdb   : > { %912 = vrot.lane.b32.xlu1 %v854_v27, %s2207_s30  ;;  %3957 = vst [vmem:[#allocation27_spill] sm:$0xff] %v2768_v20 }
  0xdc   : > { %910 = vrot.lane.b32.xlu0 %v850_v42, %s2207_s30  ;;  %v758_v15 = vpop.permute.xlu2 %757  ;;  %v1091_v42 = vrot.slane %v2396_v61, 3  ;;  %v3891_v61 = vrot.slane %v2456_v55, 2 }
  0xdd   : > { %v2756_v60 = vpop.permute.xlu1 %735  ;;  %v2761_v62 = vsel %vm1343_vm5, %v1306_v6, %v758_v15  ;;  %v1271_v6 = vsel %vm1261_vm3, %v2267_v0, %v2584_v28  ;;  %v1291_v0 = vsel %vm1261_vm3, %v3960_v63, %v2613_v58 }
  0xde   : > { %v2763_v27 = vpop.permute.xlu0 %733  ;;  %v2790_v45 = vor.u32 %v1091_v42, %v1090_v21  ;;  %v1312_v28 = vsel %vm1302_vm4, %v1271_v6, %v722_v50  ;;  %v2814_v58 = vsel %vm926_vm6, %v958_v17, %v3891_v61  ;;  %v1111_v6 = vrot.slane %v3956_v3, 3 }
  0xdf   : > { %v1297_v17 = vsel %vm1261_vm3, %v2438_v36, %v2622_v59 }
  0xe0   : > { %3959 = vst [vmem:[#allocation47_spill] sm:$0xff] %v2790_v45  ;;  %v1097_v50 = vsel %vm1050_vm7, %v2790_v45, %v2792_v31 }
  0xe2   : > { %998 = vrot.lane.b32.xlu2 %v2773_v56, %s2208_s5  ;;  %v3974_v56 = vld [vmem:[#allocation30_spill] sm:$0xff] }
  0xe3   : > { %988 = vrot.lane.b32.xlu1 %v2768_v20, %s2208_s5  ;;  %v3971_v20 = vld [vmem:[#allocation4_spill] sm:$0xff] }
  0xe4   : > { %916 = vrot.lane.b32.xlu0 %v862_v23, %s2207_s30  ;;  %v764_v51 = vpop.permute.xlu2 %763  ;;  %v1289_v23 = vsel %vm1261_vm3, %v2408_v16, %v2644_v13  ;;  %v2822_v13 = vsel %vm926_vm6, %v948_v35, %v3892_v54 }
  0xe5   : > { %v742_v15 = vpop.permute.xlu1 %741  ;;  %v2806_v42 = vsel %vm1343_vm5, %v1312_v28, %v764_v51  ;;  %v1110_v51 = vrot.slane %v3955_v57, 2  ;;  %v1295_v57 = vsel %vm1261_vm3, %v2447_v47, %v2664_v25  ;;  %v3968_v25 = vrot.slane %v2438_v36, 3 }
  0xe6   : > { %v2803_v21 = vsel %vm1302_vm4, %v1291_v0, %v742_v15  ;;  %v740_v14 = vpop.permute.xlu0 %739  ;;  %v3961_v0 = vld [vmem:[#allocation36_spill] sm:$0xff]  ;;  %v1301_v36 = vsel %vm1261_vm3, %v3974_v56, %v2680_v2  ;;  %v3977_v2 = vrot.slane %v3971_v20, 2 }
  0xe7   : > { %v2809_v8 = vsel %vm1302_vm4, %v1289_v23, %v740_v14  ;;  %v1114_v28 = vrot.slane %v3961_v0, 2  ;;  %v3962_v15 = vld [vmem:[#allocation28_spill] sm:$0xff]  ;;  %v3963_v14 = vld [vmem:[#allocation13_spill] sm:$0xff]  ;;  %v2845_v45 = vor.u32 %v1111_v6, %v1110_v51  ;;  %v3966_v51 = vrot.slane %v2378_v52, 3 }
  0xe8   : > { %v1115_v23 = vrot.slane %v3962_v15, 3  ;;  %v1277_v41 = vsel %vm1261_vm3, %v3963_v14, %v2624_v32 }
  0xe9   : > { %v1318_v32 = vsel %vm1302_vm4, %v1277_v41, %v2738_v1  ;;  %3964 = vst [vmem:[#allocation21_spill] sm:$0xff] %v2845_v45  ;;  %v3965_v41 = vrot.slane %v2408_v16, 3 }
  0xea   : > { %1159 = vrot.lane.b32.xlu2 %v1097_v50, %s2210_s7  ;;  %v2847_v50 = vor.u32 %v1115_v23, %v1114_v28  ;;  %v3967_v28 = vrot.slane %v2456_v55, 3  ;;  %v3969_v23 = vld [vmem:[#allocation9_spill] sm:$0xff] }
  0xeb   : > { %1040 = vrot.lane.b32.xlu1 %v2814_v58, %s2209_s6  ;;  %v1202_v6 = vsel %vm1179_vm8, %v3966_v51, %v3965_v41  ;;  %v3972_v41 = vld [vmem:[#allocation5_spill] sm:$0xff] }
  0xec   : > { %1030 = vrot.lane.b32.xlu0 %v2822_v13, %s2209_s6  ;;  %v770_v54 = vpop.permute.xlu2 %769  ;;  %v1263_v51 = vsel %vm1261_vm3, %v3972_v41, %v2608_v10 }
  0xed   : > { %v748_v61 = vpop.permute.xlu1 %747  ;;  %v2856_v59 = vsel %vm1343_vm5, %v1318_v32, %v770_v54  ;;  %v1117_v54 = vsel %vm1050_vm7, %v2845_v45, %v2847_v50 }
  0xee   : > { %v2853_v3 = vsel %vm1302_vm4, %v1297_v17, %v748_v61  ;;  %v746_v35 = vpop.permute.xlu0 %745  ;;  %v1212_v61 = vsel %vm1179_vm8, %v3968_v25, %v3967_v28  ;;  %v3973_v28 = vld [vmem:[#allocation15_spill] sm:$0xff]  ;;  %v1304_v17 = vsel %vm1302_vm4, %v1263_v51, %v2633_v33 }
  0xef   : > { %v2859_v1 = vsel %vm1302_vm4, %v1295_v57, %v746_v35  ;;  %v938_v57 = vrot.slane %v3963_v14, 2  ;;  %v3970_v35 = vld [vmem:[#allocation3_spill] sm:$0xff]  ;;  %v1283_v25 = vsel %vm1261_vm3, %v3973_v28, %v2631_v40  ;;  %v927_v40 = vrot.slane %v2282_v5, 2 }
  0xf0   : > { %v928_v32 = vrot.slane %v3970_v35, 2  ;;  %v1324_v10 = vsel %vm1302_vm4, %v1283_v25, %v2763_v27  ;;  %v1051_v28 = vrot.slane %v2300_v11, 2  ;;  %v1054_v5 = vrot.slane %v2323_v26, 2  ;;  %v3978_v11 = vld [vmem:[#allocation41_spill] sm:$0xff] }
  0xf2   : > { %1251 = vrot.lane.b32.xlu2 %v1212_v61, %s2211_s8  ;;  %v3975_v61 = vrot.slane %v3969_v23, 2  ;;  %v2909_v27 = vsel %vm926_vm6, %v928_v32, %v3977_v2  ;;  %v1075_v2 = vrot.slane %v2345_v38, 3  ;;  %v929_v47 = vsel %vm926_vm6, %v927_v40, %v928_v32 }
  0xf3   : > { %1241 = vrot.lane.b32.xlu1 %v1202_v6, %s2211_s8 }
  0xf4   : > { %1169 = vrot.lane.b32.xlu0 %v1117_v54, %s2210_s7  ;;  %v776_v6 = vpop.permute.xlu2 %775  ;;  %v2897_v45 = vsel %vm926_vm6, %v3975_v61, %v938_v57  ;;  %v1052_v61 = vrot.slane %v2294_v9, 3 }
  0xf5   : > { %v756_v41 = vpop.permute.xlu1 %755  ;;  %3976 = vst [vmem:[#allocation36_spill] sm:$0xff] %v2897_v45  ;;  %v2904_v54 = vsel %vm1343_vm5, %v1324_v10, %v776_v6  ;;  %v1070_v10 = vrot.slane %v2366_v48, 2  ;;  %v1074_v6 = vrot.slane %v2355_v43, 2  ;;  %v3980_v48 = vld [vmem:[#allocation45_spill] sm:$0xff] }
  0xf6   : > { %v2901_v33 = vsel %vm1343_vm5, %v1304_v17, %v756_v41  ;;  %v752_v51 = vpop.permute.xlu0 %751  ;;  %v1055_v17 = vrot.slane %v2303_v12, 3  ;;  %v1071_v41 = vrot.slane %v2348_v39, 3  ;;  %v1053_v9 = vor.u32 %v1052_v61, %v1051_v28  ;;  %v3979_v39 = vld [vmem:[#allocation40_spill] sm:$0xff] }
  0xf7   : > { %v2913_v25 = vsel %vm1302_vm4, %v1301_v36, %v752_v51  ;;  %v1269_v36 = vsel %vm1261_vm3, %v3971_v20, %v3978_v11  ;;  %v2935_v38 = vor.u32 %v1075_v2, %v1074_v6  ;;  %v1267_v43 = vsel %vm1261_vm3, %v3970_v35, %v3979_v39  ;;  %v3981_v11 = vld [vmem:[#allocation12_spill] sm:$0xff]  ;;  %v3983_v39 = vld [vmem:[#allocation37_spill] sm:$0xff] }
  0xf8   : > { %v2931_v12 = vor.u32 %v1055_v17, %v1054_v5  ;;  %v2933_v26 = vor.u32 %v1071_v41, %v1070_v10  ;;  %v1310_v32 = vsel %vm1302_vm4, %v1269_v36, %v3980_v48  ;;  %v863_v6 = vrot.slane %v3961_v0, 1 }
  0xf9   : > { %v3900_v0 = vrot.slane %v3963_v14, 3 }
  0xfa   : > { %1010 = vrot.lane.b32.xlu2 %v2909_v27, %s2209_s6  ;;  %v1057_v10 = vsel %vm1050_vm7, %v1053_v9, %v2931_v12  ;;  %v1077_v41 = vsel %vm1050_vm7, %v2933_v26, %v2935_v38 }
  0xfb   : > { %978 = vrot.lane.b32.xlu1 %v2897_v45, %s2208_s5  ;;  %v940_v45 = vrot.slane %v3981_v11, 2 }
  0xfc   : > { %968 = vrot.lane.b32.xlu0 %v929_v47, %s2208_s5  ;;  %v782_v51 = vpop.permute.xlu2 %781  ;;  %v1308_v47 = vsel %vm1302_vm4, %v1267_v43, %v2696_v37  ;;  %v864_v37 = vrot.slane %v3962_v15, 2  ;;  %v1191_v15 = vrot.slane %v3981_v11, 3 }
  0xfd   : > { %v762_v40 = vpop.permute.xlu1 %761  ;;  %v2950_v61 = vsel %vm1343_vm5, %v2809_v8, %v782_v51  ;;  %v2963_v2 = vsel %vm926_vm6, %v938_v57, %v940_v45  ;;  %v3982_v8 = vld [vmem:[#allocation42_spill] sm:$0xff]  ;;  %v1180_v51 = vrot.slane %v3970_v35, 3 }
  0xfe   : > { %v2946_v28 = vsel %vm1343_vm5, %v1310_v32, %v762_v40  ;;  %v760_v5 = vpop.permute.xlu0 %759  ;;  %v1275_v36 = vsel %vm1261_vm3, %v3969_v23, %v3982_v8  ;;  %v2974_v9 = vor.u32 %v864_v37, %v863_v6  ;;  %v3984_v57 = vld [vmem:[#allocation2_spill] sm:$0xff]  ;;  %v3985_v8 = vld [vmem:[#allocation43_spill] sm:$0xff] }
  0xff   : > { %v1349_v17 = vsel %vm1343_vm5, %v1308_v47, %v760_v5  ;;  %v1273_v43 = vsel %vm1261_vm3, %v3984_v57, %v3983_v39  ;;  %v1316_v48 = vsel %vm1302_vm4, %v1275_v36, %v2666_v7  ;;  %v1181_v47 = vrot.slane %v3971_v20, 3  ;;  %v3986_v36 = vld [vmem:[#allocation14_spill] sm:$0xff] }
 0x100   : > { %v1314_v5 = vsel %vm1302_vm4, %v1273_v43, %v2714_v53  ;;  %v1192_v7 = vsel %vm1179_vm8, %v3900_v0, %v1191_v15  ;;  %v866_v53 = vsel %vm795_vm2, %v2758_v18, %v2974_v9  ;;  %v1281_v39 = vsel %vm1261_vm3, %v3986_v36, %v3985_v8  ;;  %v3987_v57 = vld [vmem:[#allocation38_spill] sm:$0xff] }
 0x101   : > { %v1182_v35 = vsel %vm1179_vm8, %v1180_v51, %v1181_v47  ;;  %v1279_v18 = vsel %vm1261_vm3, %v3981_v11, %v3987_v57  ;;  %v1322_v43 = vsel %vm1302_vm4, %v1281_v39, %v2682_v22  ;;  %v3989_v8 = vld [vmem:[#allocation34_spill] sm:$0xff]  ;;  %v3990_v39 = vld [vmem:[#allocation33_spill] sm:$0xff] }
 0x102   : > { %1149 = vrot.lane.b32.xlu2 %v1077_v41, %s2210_s7  ;;  %v1118_v36 = vrot.slane %v3989_v8, 2  ;;  %v1119_v57 = vrot.slane %v3990_v39, 3 }
 0x103   : > { %1139 = vrot.lane.b32.xlu1 %v1057_v10, %s2210_s7 }
 0x104   : > { %1020 = vrot.lane.b32.xlu0 %v2963_v2, %s2209_s6  ;;  %v788_v40 = vpop.permute.xlu2 %787 }
 0x105   : > { %v768_v32 = vpop.permute.xlu1 %767  ;;  %v2990_v41 = vsel %vm1343_vm5, %v2859_v1, %v788_v40  ;;  %v952_v1 = vrot.slane %v3960_v63, 2  ;;  %v1320_v40 = vsel %vm1302_vm4, %v1279_v18, %v2733_v30  ;;  %v1099_v30 = vrot.slane %v2424_v29, 3 }
 0x106   : > { %v2986_v10 = vsel %vm1343_vm5, %v1316_v48, %v768_v32  ;;  %v766_v6 = vpop.permute.xlu0 %765  ;;  %v3048_v29 = vor.u32 %v1119_v57, %v1118_v36 }
 0x107   : > { %v1355_v37 = vsel %vm1343_vm5, %v1314_v5, %v766_v6 }
 0x108   : > { %v1121_v57 = vsel %vm1050_vm7, %v2847_v50, %v3048_v29 }
 0x10a   : > { %918 = vrot.lane.b32.xlu2 %v866_v53, %s2207_s30  ;;  %v3988_v53 = vrot.slane %v2408_v16, 2 }
 0x10b   : > { %1231 = vrot.lane.b32.xlu1 %v1192_v7, %s2211_s8 }
 0x10c   : > { %1221 = vrot.lane.b32.xlu0 %v1182_v35, %s2211_s8  ;;  %v794_v32 = vpop.permute.xlu2 %793  ;;  %v3031_v22 = vsel %vm926_vm6, %v3988_v53, %v952_v1  ;;  %v1098_v35 = vrot.slane %v2432_v34, 2 }
 0x10d   : > { %v774_v48 = vpop.permute.xlu1 %773  ;;  %v3023_v5 = vsel %vm1343_vm5, %v2913_v25, %v794_v32  ;;  %v3991_v25 = vld [vmem:[#allocation46_spill] sm:$0xff] }
 0x10e   : > { %v3019_v51 = vsel %vm1343_vm5, %v1322_v43, %v774_v48  ;;  %v772_v6 = vpop.permute.xlu0 %771  ;;  %v1287_v18 = vsel %vm1261_vm3, %v2378_v52, %v3991_v25  ;;  %v3046_v34 = vor.u32 %v1099_v30, %v1098_v35  ;;  %v3992_v43 = vld [vmem:[#allocation39_spill] sm:$0xff] }
 0x10f   : > { %v1361_v7 = vsel %vm1343_vm5, %v1320_v40, %v772_v6  ;;  %v1285_v48 = vsel %vm1261_vm3, %v2358_v44, %v3992_v43  ;;  %v962_v6 = vrot.slane %v3974_v56, 2 }
 0x110   : > { %v1326_v53 = vsel %vm1302_vm4, %v1285_v48, %v2756_v60  ;;  %v3993_v60 = vrot.slane %v2456_v55, 2 }
 0x112   : > { %1032 = vrot.lane.b32.xlu2 %v3031_v22, %s2209_s6  ;;  %v3076_v25 = vsel %vm926_vm6, %v3993_v60, %v962_v6 }
 0x113   : > { %1000 = vrot.lane.b32.xlu1 %v2814_v58, %s2208_s5  ;;  %v1328_v58 = vsel %vm1302_vm4, %v1287_v18, %v2698_v49  ;;  %v1101_v49 = vsel %vm1050_vm7, %v2792_v31, %v3046_v34  ;;  %v1213_v31 = vrot.slane %v3974_v56, 3  ;;  %v1203_v18 = vrot.slane %v3960_v63, 3  ;;  %v3314_v56 = vld [vmem:[%s2264_s22 + $0x28] sm:$0xff] }
 0x114   : > { %990 = vrot.lane.b32.xlu0 %v2822_v13, %s2208_s5  ;;  %v891_v40 = vpop.permute.xlu2 %890 }
 0x115   : > { %v780_v32 = vpop.permute.xlu1 %779  ;;  %v3062_v35 = vsel %vm1384_vm9, %v1349_v17, %v891_v40  ;;  %v3994_v40 = vrot.slane %v2456_v55, 3  ;;  %v3112_v55 = vld [vmem:[%s2264_s22 + $0x48] sm:$0xff] }
 0x116   : > { %v3059_v13 = vsel %vm1343_vm5, %v1328_v58, %v780_v32  ;;  %v778_v30 = vpop.permute.xlu0 %777 }
 0x117   : > { %v1367_v36 = vsel %vm1343_vm5, %v1326_v53, %v778_v30  ;;  %v1214_v53 = vsel %vm1179_vm8, %v3994_v40, %v1213_v31  ;;  %v3995_v30 = vrot.slane %v2408_v16, 3 }
 0x11a   : > { %1171 = vrot.lane.b32.xlu2 %v1121_v57, %s2210_s7 }
 0x11b   : > { %1161 = vrot.lane.b32.xlu1 %v1101_v49, %s2210_s7  ;;  %v942_v49 = vrot.slane %v3112_v55, 2 }
 0x11c   : > { %1042 = vrot.lane.b32.xlu0 %v3076_v25, %s2209_s6  ;;  %v897_v50 = vpop.permute.xlu2 %896 }
 0x11d   : > { %v786_v17 = vpop.permute.xlu1 %785  ;;  %v3089_v48 = vsel %vm1384_vm9, %v1355_v37, %v897_v50 }
 0x11e   : > { %v3086_v43 = vsel %vm1343_vm5, %v2717_v4, %v786_v17  ;;  %v784_v58 = vpop.permute.xlu0 %783  ;;  %v1204_v4 = vsel %vm1179_vm8, %v3995_v30, %v1203_v18 }
 0x11f   : > { %v1373_v32 = vsel %vm1343_vm5, %v2803_v21, %v784_v58  ;;  %v3108_v21 = vld [vmem:[%s2264_s22 + $0x20] sm:$0xff]  ;;  %v3996_v58 = vrot.slane %v3971_v20, 2 }
 0x120   : > { %v932_v37 = vrot.slane %v3108_v21, 2 }
 0x122   : > { %970 = vrot.lane.b32.xlu2 %v2909_v27, %s2208_s5  ;;  %v3131_v40 = vsel %vm926_vm6, %v3996_v58, %v932_v37 }
 0x123   : > { %1253 = vrot.lane.b32.xlu1 %v1214_v53, %s2211_s8  ;;  %v1079_v53 = vrot.slane %v2362_v46, 3 }
 0x124   : > { %1243 = vrot.lane.b32.xlu0 %v1204_v4, %s2211_s8  ;;  %v903_v60 = vpop.permute.xlu2 %902  ;;  %v3998_v4 = vld [vmem:[#allocation6_spill] sm:$0xff] }
 0x125   : > { %v792_v57 = vpop.permute.xlu1 %791  ;;  %v3120_v17 = vsel %vm1384_vm9, %v1361_v7, %v903_v60  ;;  %v1078_v7 = vrot.slane %v2412_v19, 2 }
 0x126   : > { %v3117_v16 = vsel %vm1343_vm5, %v2736_v24, %v792_v57  ;;  %v790_v27 = vpop.permute.xlu0 %789  ;;  %v3138_v24 = vsel %vm926_vm6, %v940_v45, %v942_v49  ;;  %v1059_v57 = vrot.slane %v3998_v4, 3  ;;  %v1183_v45 = vrot.slane %v3108_v21, 3 }
 0x127   : > { %v3124_v50 = vsel %vm1343_vm5, %v2853_v3, %v790_v27  ;;  %v3997_v3 = vld [vmem:[#allocation7_spill] sm:$0xff]  ;;  %v3150_v60 = vor.u32 %v1079_v53, %v1078_v7 }
 0x128   : > { %v1058_v30 = vrot.slane %v3997_v3, 2  ;;  %v1184_v7 = vsel %vm1179_vm8, %v1181_v47, %v1183_v45  ;;  %v1193_v47 = vrot.slane %v3112_v55, 3 }
 0x12a   : > { %1022 = vrot.lane.b32.xlu2 %v3138_v24, %s2209_s6  ;;  %v3153_v46 = vor.u32 %v1059_v57, %v1058_v30 }
 0x12b   : > { %1012 = vrot.lane.b32.xlu1 %v3131_v40, %s2209_s6 }
 0x12c   : > { %980 = vrot.lane.b32.xlu0 %v2963_v2, %s2208_s5  ;;  %v909_v27 = vpop.permute.xlu2 %908  ;;  %v1081_v2 = vsel %vm1050_vm7, %v2935_v38, %v3150_v60  ;;  %v1061_v53 = vsel %vm1050_vm7, %v2931_v12, %v3153_v46 }
 0x12d   : > { %v889_v19 = vpop.permute.xlu1 %888  ;;  %v3160_v3 = vsel %vm1384_vm9, %v1367_v36, %v909_v27  ;;  %v868_v36 = vrot.slane %v3990_v39, 2 }
 0x12e   : > { %v3157_v58 = vsel %vm1384_vm9, %v2761_v62, %v889_v19  ;;  %v887_v4 = vpop.permute.xlu0 %886  ;;  %v867_v62 = vrot.slane %v3989_v8, 1  ;;  %v1194_v19 = vsel %vm1179_vm8, %v1191_v15, %v1193_v47 }
 0x12f   : > { %v3164_v0 = vsel %vm1384_vm9, %v2901_v33, %v887_v4 }
 0x130   : > { %v3182_v33 = vor.u32 %v868_v36, %v867_v62  ;;  %v4000_v62 = vld [vmem:[#allocation35_spill] sm:$0xff] }
 0x131   : > { %v1123_v36 = vrot.slane %v4000_v62, 3 }
 0x132   : > { %1223 = vrot.lane.b32.xlu2 %v1184_v7, %s2211_s8  ;;  %v870_v57 = vsel %vm795_vm2, %v2974_v9, %v3182_v33 }
 0x133   : > { %1151 = vrot.lane.b32.xlu1 %v1081_v2, %s2210_s7 }
 0x134   : > { %1141 = vrot.lane.b32.xlu0 %v1061_v53, %s2210_s7  ;;  %v915_v38 = vpop.permute.xlu2 %914 }
 0x135   : > { %v895_v20 = vpop.permute.xlu1 %894  ;;  %v3190_v39 = vsel %vm1384_vm9, %v1373_v32, %v915_v38  ;;  %v4001_v38 = vld [vmem:[#allocation31_spill] sm:$0xff] }
 0x136   : > { %v3187_v8 = vsel %vm1384_vm9, %v2806_v42, %v895_v20  ;;  %v893_v12 = vpop.permute.xlu0 %892  ;;  %v3999_v42 = vld [vmem:[#allocation32_spill] sm:$0xff]  ;;  %v2129_v20 = vld [vmem:[%s3832_s2] sm:$0x10] }
 0x137   : > { %v3194_v30 = vsel %vm1384_vm9, %v2946_v28, %v893_v12  ;;  %v871_v32 = vshrl.u32 %v3999_v42, 16  ;;  %v3210_v28 = vld [vmem:[%s2264_s22 + $0x78] sm:$0xff]  ;;  %v3902_v9 = vrot.slane %v3999_v42, 2  ;;  %v1102_v12 = vrot.slane %v4001_v38, 2 }
 0x138   : > { %v3901_v27 = vrot.slane %v3210_v28, 2  ;;  %v1205_v38 = vrot.slane %v3210_v28, 3 }
 0x139   : > { %v1122_v7 = vrot.slane %v871_v32, 2 }
 0x13a   : > { %992 = vrot.lane.b32.xlu2 %v3031_v22, %s2208_s5  ;;  %v3232_v53 = vsel %vm926_vm6, %v952_v1, %v3901_v27  ;;  %v4002_v1 = vld [vmem:[#allocation22_spill] sm:$0xff] }
 0x13b   : > { %920 = vrot.lane.b32.xlu1 %v870_v57, %s2207_s30  ;;  %v1103_v57 = vrot.slane %v4002_v1, 3  ;;  %v3256_v27 = vor.u32 %v1123_v36, %v1122_v7  ;;  %v1206_v7 = vsel %vm1179_vm8, %v1203_v18, %v1205_v38 }
 0x13c   : > { %1233 = vrot.lane.b32.xlu0 %v1194_v19, %s2211_s8  ;;  %v3214_v2 = vpop.permute.xlu2 %998 }
 0x13d   : > { %v901_v4 = vpop.permute.xlu1 %900 }
 0x13e   : > { %v3218_v11 = vsel %vm1384_vm9, %v2856_v59, %v901_v4  ;;  %v899_v15 = vpop.permute.xlu0 %898  ;;  %v3239_v59 = vsel %vm926_vm6, %v962_v6, %v3902_v9  ;;  %v2212_v4 = vmov 65535  }
 0x13f   : > { %v3222_v22 = vsel %vm1384_vm9, %v2986_v10, %v899_v15  ;;  %v2081_v10 = vld [vmem:[%s3832_s2] sm:$0xf]  ;;  %v1643_v15 = vsel %vm1641_vm10, 4294967295, %v2212_v4 }
 0x140   : > { %v2082_v19 = vor.u32 %v2129_v20, %v2081_v10  ;;  %v1644_v6 = vsel %vm1179_vm8, %v1643_v15, 0  ;;  %v3261_v20 = vor.u32 %v1103_v57, %v1102_v12  ;;  %v4003_v57 = vld [vmem:[#allocation10_spill] sm:$0xff] }
 0x142   : > { %1044 = vrot.lane.b32.xlu2 %v3239_v59, %s2209_s6  ;;  %v1646_v9 = vand.u32 %v2082_v19, %v1644_v6  ;;  %v1105_v36 = vsel %vm1050_vm7, %v3046_v34, %v3261_v20  ;;  %v1062_v19 = vrot.slane %v4003_v57, 2  ;;  %v4004_v6 = vld [vmem:[#allocation8_spill] sm:$0xff] }
 0x143   : > { %1034 = vrot.lane.b32.xlu1 %v3232_v53, %s2209_s6 }
 0x144   : > { %1002 = vrot.lane.b32.xlu0 %v3076_v25, %s2208_s5  ;;  %v3259_v10 = vpop.permute.xlu2 %1159  ;;  %2131 = vmatpush.bf16.msra.mxu2 %v1646_v9  ;;  %v1125_v25 = vsel %vm1050_vm7, %v3048_v29, %v3256_v27  ;;  %v3282_v29 = vld [vmem:[%s2494_s27] sm:$0xff] }
 0x145   : > { %v907_v1 = vpop.permute.xlu1 %906  ;;  %2132 = vmatpush.bf16.msra.mxu3 %v1646_v9  ;;  %1655 = vmatpush.bf16.msra.mxu0 %v1646_v9  ;;  %v3904_v63 = vrot.slane %v3282_v29, 3 }
 0x146   : > { %v905_v4 = vpop.permute.xlu0 %904  ;;  %2130 = vmatpush.bf16.msra.mxu1 %v1646_v9 }
 0x147   : > { %v3265_v15 = vsel %vm1384_vm9, %v3019_v51, %v905_v4  ;;  %v1063_v4 = vrot.slane %v4004_v6, 3 }
 0x14a   : > { %1245 = vrot.lane.b32.xlu2 %v1206_v7, %s2211_s8  ;;  %v3309_v7 = vor.u32 %v1063_v4, %v1062_v19  ;;  %v4005_v19 = vld [vmem:[#allocation20_spill] sm:$0xff]  ;;  %v4006_v4 = vld [vmem:[#allocation18_spill] sm:$0xff] }
 0x14b   : > { %1173 = vrot.lane.b32.xlu1 %v1125_v25, %s2210_s7  ;;  %v1216_v25 = vsel %vm1179_vm8, %v1213_v31, %v3904_v63  ;;  %v3905_v31 = vrot.slane %v3314_v56, 2  ;;  %v1082_v6 = vrot.slane %v4005_v19, 2 }
 0x14c   : > { %1163 = vrot.lane.b32.xlu0 %v1105_v36, %s2210_s7  ;;  %v1252_v9 = vpop.permute.xlu2 %1251 }
 0x14d   : > { %v913_v51 = vpop.permute.xlu1 %912  ;;  %v3332_v57 = vsel %vm926_vm6, %v932_v37, %v3905_v31 }
 0x14e   : > { %v3287_v18 = vsel %vm1384_vm9, %v2950_v61, %v913_v51  ;;  %v911_v12 = vpop.permute.xlu0 %910  ;;  %v3306_v61 = vld [vmem:[%s2264_s22 + $0x50] sm:$0xff] }
 0x14f   : > { %v3291_v34 = vsel %vm1384_vm9, %v3059_v13, %v911_v12  ;;  %v3903_v13 = vrot.slane %v3306_v61, 2 }
 0x152   : > { %982 = vrot.lane.b32.xlu2 %v3138_v24, %s2208_s5  ;;  %v1065_v24 = vsel %vm1050_vm7, %v3153_v46, %v3309_v7  ;;  %v1195_v46 = vrot.slane %v3306_v61, 3 }
 0x153   : > { %972 = vrot.lane.b32.xlu1 %v3131_v40, %s2208_s5  ;;  %v3322_v40 = vsel %vm926_vm6, %v942_v49, %v3903_v13  ;;  %v1185_v49 = vrot.slane %v3314_v56, 3 }
 0x154   : > { %1255 = vrot.lane.b32.xlu0 %v1216_v25, %s2211_s8  ;;  %v3311_v51 = vpop.permute.xlu2 %1010  ;;  %v1083_v25 = vrot.slane %v4006_v4, 3  ;;  %v1406_v4 = vsel %vm1384_vm9, %v2904_v54, %v907_v1  ;;  %v1196_v31 = vsel %vm1179_vm8, %v1193_v47, %v1195_v46  ;;  %v873_v54 = vrot.slane %v871_v32, 1 }
 0x155   : > { %v989_v36 = vpop.permute.xlu1 %988  ;;  %v874_v1 = vrot.slane %v4000_v62, 2 }
 0x156   : > { %v917_v12 = vpop.permute.xlu0 %916  ;;  %v3345_v37 = vor.u32 %v1083_v25, %v1082_v6  ;;  %v1447_v6 = vsel %vm1425_vm11, %v1406_v4, %v989_v36 }
 0x157   : > { %v1416_v21 = vsel %vm1384_vm9, %v3086_v43, %v917_v12  ;;  %v3378_v32 = vor.u32 %v874_v1, %v873_v54 }
 0x158   : > { %v1085_v25 = vsel %vm1050_vm7, %v3150_v60, %v3345_v37  ;;  %v1457_v55 = vsel %vm1425_vm11, %v1416_v21, %v3214_v2  ;;  %v4007_v2 = vld [vmem:[#allocation29_spill] sm:$0xff] }
 0x159   : > { %v1106_v4 = vrot.slane %v4007_v2, 2 }
 0x15a   : > { %1143 = vrot.lane.b32.xlu2 %v1065_v24, %s2210_s7  ;;  %v1186_v24 = vsel %vm1179_vm8, %v1183_v45, %v1185_v49 }
 0x15b   : > { %1024 = vrot.lane.b32.xlu1 %v3322_v40, %s2209_s6 }
 0x15c   : > { %1014 = vrot.lane.b32.xlu0 %v3332_v57, %s2209_s6  ;;  %v3343_v63 = vpop.permute.xlu2 %1149 }
 0x15d   : > { %v1041_v13 = vpop.permute.xlu1 %1040 }
 0x15e   : > { %v1031_v19 = vpop.permute.xlu0 %1030  ;;  %v1498_v62 = vsel %vm1466_vm12, %v1457_v55, %v1041_v13  ;;  %v4009_v13 = vld [vmem:[#allocation44_spill] sm:$0xff] }
 0x15f   : > { %v1488_v45 = vsel %vm1466_vm12, %v1447_v6, %v1031_v19  ;;  %v878_v21 = vshrl.u32 %v4009_v13, 16 }
 0x160   : > { %v1529_v43 = vsel %vm1507_vm13, %v1488_v45, %v3259_v10  ;;  %v876_v10 = vsel %vm795_vm2, %v3182_v33, %v3378_v32  ;;  %v881_v33 = vshll.u32 %v4009_v13, 16 }
 0x162   : > { %1235 = vrot.lane.b32.xlu2 %v1196_v31, %s2211_s8 }
 0x163   : > { %1225 = vrot.lane.b32.xlu1 %v1186_v24, %s2211_s8  ;;  %v4008_v24 = vld [vmem:[#allocation26_spill] sm:$0xff] }
 0x164   : > { %1153 = vrot.lane.b32.xlu0 %v1085_v25, %s2210_s7  ;;  %v3374_v47 = vpop.permute.xlu2 %918  ;;  %v1107_v6 = vrot.slane %v4008_v24, 3 }
 0x165   : > { %v1242_v60 = vpop.permute.xlu1 %1241 }
 0x166   : > { %v1170_v36 = vpop.permute.xlu0 %1169  ;;  %v1570_v31 = vsel %vm1548_vm14, %v1529_v43, %v1242_v60  ;;  %v3397_v25 = vor.u32 %v1107_v6, %v1106_v4  ;;  %v4011_v60 = vld [vmem:[#allocation24_spill] sm:$0xff] }
 0x167   : > { %v1539_v12 = vsel %vm1507_vm13, %v1498_v62, %v1170_v36  ;;  %2093 = vmatmul.msk.bf16.vlgmr.msra.gmra.mxu2 %vm1600_vm15, %v1570_v31  ;;  %v4012_v43 = vrot.slane %v4011_v60, 2  ;;  %v4013_v62 = vrot.slane %v3210_v28, 2  ;;  %v1126_v31 = vrot.slane %v878_v21, 2 }
 0x168   : > { %v1580_v19 = vsel %vm1548_vm14, %v1539_v12, %v1252_v9  ;;  %v966_v9 = vrot.slane %v4009_v13, 2  ;;  %v1109_v55 = vsel %vm1050_vm7, %v3261_v20, %v3397_v25  ;;  %v1127_v12 = vrot.slane %v881_v33, 3 }
 0x169   : > { %2098 = vmatmul.msk.bf16.vlgmr.msra.gmra.mxu3 %vm1600_vm15, %v1580_v19  ;;  %v3418_v36 = vsel %vm926_vm6, %v4013_v62, %v4012_v43  ;;  %v1217_v19 = vrot.slane %v4009_v13, 3 }
 0x16a   : > { %1004 = vrot.lane.b32.xlu2 %v3239_v59, %s2208_s5  ;;  %v3432_v24 = vor.u32 %v1127_v12, %v1126_v31  ;;  %v4015_v12 = vrot.slane %v3969_v23, 2 }
 0x16b   : > { %994 = vrot.lane.b32.xlu1 %v3232_v53, %s2208_s5  ;;  %v4010_v53 = vrot.slane %v3999_v42, 2  ;;  %v3426_v42 = vld [vmem:[%s2264_s22 + $0x80] sm:$0xff] }
 0x16c   : > { %922 = vrot.lane.b32.xlu0 %v876_v10, %s2207_s30  ;;  %v3399_v1 = vpop.permute.xlu2 %1032  ;;  %v1207_v20 = vrot.slane %v3426_v42, 3  ;;  %v1129_v43 = vsel %vm1050_vm7, %v3256_v27, %v3432_v24 }
 0x16d   : > { %v979_v54 = vpop.permute.xlu1 %978  ;;  %v3408_v59 = vsel %vm926_vm6, %v4010_v53, %v966_v9  ;;  %v4014_v53 = vrot.slane %v3282_v29, 3 }
 0x16e   : > { %v969_v45 = vpop.permute.xlu0 %968  ;;  %v1208_v10 = vsel %vm1179_vm8, %v1205_v38, %v1207_v20  ;;  %v1437_v60 = vsel %vm1425_vm11, %v3089_v48, %v979_v54 }
 0x16f   : > { %v1427_v62 = vsel %vm1425_vm11, %v3164_v0, %v969_v45 }
 0x170   : > { %v1468_v38 = vsel %vm1466_vm12, %v1427_v62, %v3311_v51 }
 0x172   : > { %1165 = vrot.lane.b32.xlu2 %v1109_v55, %s2210_s7  ;;  %v1218_v55 = vsel %vm1179_vm8, %v4014_v53, %v1217_v19  ;;  %v4018_v53 = vld [vmem:[#allocation11_spill] sm:$0xff] }
 0x173   : > { %1046 = vrot.lane.b32.xlu1 %v3408_v59, %s2209_s6 }
 0x174   : > { %1036 = vrot.lane.b32.xlu0 %v3418_v36, %s2209_s6  ;;  %v3430_v4 = vpop.permute.xlu2 %1171 }
 0x175   : > { %v1140_v2 = vpop.permute.xlu1 %1139 }
 0x176   : > { %v1021_v6 = vpop.permute.xlu0 %1020  ;;  %v1509_v54 = vsel %vm1507_vm13, %v1468_v38, %v1140_v2  ;;  %v1067_v2 = vrot.slane %v4018_v53, 3 }
 0x177   : > { %v1478_v28 = vsel %vm1466_vm12, %v1437_v60, %v1021_v6  ;;  %v4016_v6 = vrot.slane %v3314_v56, 2 }
 0x178   : > { %v1519_v27 = vsel %vm1507_vm13, %v1478_v28, %v3343_v63 }
 0x179   : > { %v3470_v51 = vsel %vm926_vm6, %v4016_v6, %v4015_v12  ;;  %v352_v6 = vld [vmem:[%s2494_s27 + $0x10] sm:$0xf] }
 0x17a   : > { %1257 = vrot.lane.b32.xlu2 %v1218_v55, %s2211_s8  ;;  %v4019_v55 = vld [vmem:[#allocation19_spill] sm:$0xff] }
 0x17b   : > { %1247 = vrot.lane.b32.xlu1 %v1208_v10, %s2211_s8  ;;  %v4017_v10 = vld [vmem:[#allocation16_spill] sm:$0xff]  ;;  %v1086_v60 = vrot.slane %v4019_v55, 2  ;;  %v1418_v55 = vsel %vm1384_vm9, %v2990_v41, %v3374_v47 }
 0x17c   : > { %1175 = vrot.lane.b32.xlu0 %v1129_v43, %s2210_s7  ;;  %v3457_v48 = vpop.permute.xlu2 %970  ;;  %v1066_v63 = vrot.slane %v4017_v10, 2  ;;  %v4020_v43 = vld [vmem:[#allocation17_spill] sm:$0xff] }
 0x17d   : > { %v1232_v29 = vpop.permute.xlu1 %1231  ;;  %v1087_v62 = vrot.slane %v4020_v43, 3 }
 0x17e   : > { %v1222_v0 = vpop.permute.xlu0 %1221  ;;  %v1560_v45 = vsel %vm1548_vm14, %v1519_v27, %v1232_v29  ;;  %v3483_v23 = vor.u32 %v1067_v2, %v1066_v63  ;;  %v3512_v63 = vld [vmem:[%s2264_s22 + $0x30] sm:$0xff] }
 0x17f   : > { %v1550_v31 = vsel %vm1548_vm14, %v1509_v54, %v1222_v0  ;;  %2088 = vmatmul.msk.bf16.vlgmr.msra.gmra.mxu1 %vm1600_vm15, %v1560_v45  ;;  %v3485_v28 = vor.u32 %v1087_v62, %v1086_v60  ;;  %v880_v0 = vrot.slane %v878_v21, 1  ;;  %v883_v45 = vrot.slane %v881_v33, 2 }
 0x180   : > { %2083 = vmatmul.msk.bf16.vlgmr.msra.gmra.mxu0 %vm1600_vm15, %v1550_v31  ;;  %v4022_v31 = vrot.slane %v3306_v61, 2  ;;  %v462_v33 = vunpack.c.l.b16 %v352_v6  ;;  %v1187_v53 = vrot.slane %v3512_v63, 3 }
 0x181   : > { %v1089_v54 = vsel %vm1050_vm7, %v3345_v37, %v3485_v28  ;;  %v884_v21 = vor.u32 %v883_v45, %v880_v0 }
 0x182   : > { %1016 = vrot.lane.b32.xlu2 %v3470_v51, %s2209_s6  ;;  %v465_v62 = vpack.c.b16 %v462_v33, %v462_v33 }
 0x183   : > { %984 = vrot.lane.b32.xlu1 %v3322_v40, %s2208_s5  ;;  %v1069_v40 = vsel %vm1050_vm7, %v3309_v7, %v3483_v23  ;;  %v3508_v7 = vld [vmem:[%s2264_s22 + $0x58] sm:$0xff]  ;;  %v885_v43 = vsel %vm795_vm2, %v3378_v32, %v884_v21  ;;  %s3659_s22 = scalar_lea.vmem %s3834_s4, %s2135_s19 }
 0x184   : > { %974 = vrot.lane.b32.xlu0 %v3332_v57, %s2208_s5  ;;  %v3487_v29 = vpop.permute.xlu2 %1022  ;;  %v4021_v57 = vrot.slane %v2358_v44, 2  ;;  %v1197_v37 = vrot.slane %v3508_v7, 3  ;;  %v1131_v61 = vshrl.u32 %v465_v62, 16  ;;  %v1008_v33 = vrot.slane %v465_v62, 2 }
 0x185   : > { %v1001_v38 = vpop.permute.xlu1 %1000 }
 0x186   : > { %v991_v27 = vpop.permute.xlu0 %990  ;;  %v3500_v12 = vsel %vm926_vm6, %v4022_v31, %v4021_v57  ;;  %v1198_v60 = vsel %vm1179_vm8, %v1195_v46, %v1197_v37  ;;  %v1134_v46 = vshll.u32 %v465_v62, 16  ;;  %v1133_v57 = vrot.slane %v1131_v61, 2 }
 0x187   : > { %v1449_v41 = vsel %vm1425_vm11, %v3160_v3, %v991_v27 }
 0x188   : > { %v1490_v32 = vsel %vm1466_vm12, %v1449_v41, %v3399_v1  ;;  %v1136_v31 = vrot.slane %v1134_v46, 3  ;;  %v4023_v1 = vld [vmem:[#allocation25_spill] sm:$0xff] }
 0x18a   : > { %1155 = vrot.lane.b32.xlu2 %v1089_v54, %s2210_s7  ;;  %v1188_v54 = vsel %vm1179_vm8, %v1185_v49, %v1187_v53 }
 0x18b   : > { %1145 = vrot.lane.b32.xlu1 %v1069_v40, %s2210_s7  ;;  %v1459_v40 = vsel %vm1425_vm11, %v1418_v55, %v1001_v38 }
 0x18c   : > { %1026 = vrot.lane.b32.xlu0 %v3500_v12, %s2209_s6  ;;  %v1224_v10 = vpop.permute.xlu2 %1223 }
 0x18d   : > { %v1162_v44 = vpop.permute.xlu1 %1161 }
 0x18e   : > { %v1043_v2 = vpop.permute.xlu0 %1042  ;;  %v1531_v3 = vsel %vm1507_vm13, %v1490_v32, %v1162_v44  ;;  %v4028_v32 = vld [vmem:[#allocation27_spill] sm:$0xff] }
 0x18f   : > { %v1500_v47 = vsel %vm1466_vm12, %v1459_v40, %v1043_v2  ;;  %v4024_v2 = vld [vmem:[#allocation21_spill] sm:$0xff] }
 0x190   : > { %v1541_v49 = vsel %vm1507_vm13, %v1500_v47, %v3430_v4  ;;  %v1137_v4 = vor.u32 %v1136_v31, %v1133_v57  ;;  %v1113_v55 = vsel %vm1050_vm7, %v3397_v25, %v4024_v2 }
 0x192   : > { %924 = vrot.lane.b32.xlu2 %v885_v43, %s2207_s30  ;;  %v1429_v43 = vsel %vm1425_vm11, %v3157_v58, %v3457_v48 }
 0x193   : > { %1237 = vrot.lane.b32.xlu1 %v1198_v60, %s2211_s8  ;;  %v1138_v60 = vsel %vm1050_vm7, %v3432_v24, %v1137_v4 }
 0x194   : > { %1227 = vrot.lane.b32.xlu0 %v1188_v54, %s2211_s8  ;;  %v993_v56 = vpop.permute.xlu2 %992 }
 0x195   : > { %v1254_v38 = vpop.permute.xlu1 %1253 }
 0x196   : > { %v1244_v27 = vpop.permute.xlu0 %1243  ;;  %v1582_v0 = vsel %vm1548_vm14, %v1541_v49, %v1254_v38  ;;  %v4029_v49 = vld [vmem:[#allocation47_spill] sm:$0xff] }
 0x197   : > { %v1572_v45 = vsel %vm1548_vm14, %v1531_v3, %v1244_v27  ;;  %2099 = vmatmul.msk.bf16.gmra.mxu3 %vm1600_vm15, %v1582_v0  ;;  %v1093_v3 = vsel %vm1050_vm7, %v3485_v28, %v4029_v49  ;;  %v4030_v27 = vrot.slane %v3963_v14, 3 }
 0x198   : > { %2094 = vmatmul.msk.bf16.gmra.mxu2 %vm1600_vm15, %v1572_v45  ;;  %v1073_v45 = vsel %vm1050_vm7, %v3483_v23, %v2933_v26  ;;  %v4031_v23 = vrot.slane %v2378_v52, 3 }
 0x199   : > { %v1190_v0 = vsel %vm1179_vm8, %v1187_v53, %v4030_v27 }
 0x19a   : > { %1038 = vrot.lane.b32.xlu2 %v4023_v1, %s2209_s6 }
 0x19b   : > { %1006 = vrot.lane.b32.xlu1 %v3408_v59, %s2208_s5  ;;  %v1009_v59 = vsel %vm926_vm6, %v966_v9, %v1008_v33 }
 0x19c   : > { %996 = vrot.lane.b32.xlu0 %v3418_v36, %s2208_s5  ;;  %v1045_v21 = vpop.permute.xlu2 %1044  ;;  %v1219_v36 = vrot.slane %v465_v62, 3  ;;  %v4025_v62 = vld [vmem:[#allocation23_spill] sm:$0xff] }
 0x19d   : > { %v1013_v6 = vpop.permute.xlu1 %1012  ;;  %v4026_v61 = vrot.slane %v4025_v62, 3 }
 0x19e   : > { %v981_v44 = vpop.permute.xlu0 %980  ;;  %v1470_v54 = vsel %vm1466_vm12, %v1429_v43, %v1013_v6  ;;  %v1220_v47 = vsel %vm1179_vm8, %v1217_v19, %v1219_v36 }
 0x19f   : > { %v1210_v58 = vsel %vm1179_vm8, %v1207_v20, %v4026_v61  ;;  %v1439_v48 = vsel %vm1425_vm11, %v3222_v22, %v981_v44  ;;  %v4027_v22 = vld [vmem:[#allocation36_spill] sm:$0xff] }
 0x1a0   : > { %v1480_v13 = vsel %vm1466_vm12, %v1439_v48, %v3487_v29 }
 0x1a2   : > { %1177 = vrot.lane.b32.xlu2 %v1138_v60, %s2210_s7 }
 0x1a3   : > { %1167 = vrot.lane.b32.xlu1 %v1113_v55, %s2210_s7 }
 0x1a4   : > { %1048 = vrot.lane.b32.xlu0 %v1009_v59, %s2209_s6  ;;  %v1246_v25 = vpop.permute.xlu2 %1245 }
 0x1a5   : > { %v1152_v40 = vpop.permute.xlu1 %1151 }
 0x1a6   : > { %v1142_v24 = vpop.permute.xlu0 %1141  ;;  %v1521_v46 = vsel %vm1507_vm13, %v1480_v13, %v1152_v40 }
 0x1a7   : > { %v1511_v41 = vsel %vm1507_vm13, %v1470_v54, %v1142_v24 }
 0x1a8   : > { %v1552_v9 = vsel %vm1548_vm14, %v1511_v41, %v1224_v10 }
 0x1a9   : > { %2084 = vmatmul.msk.bf16.gmra.mxu0 %vm1600_vm15, %v1552_v9 }
 0x1aa   : > { %976 = vrot.lane.b32.xlu2 %v3470_v51, %s2208_s5 }
 0x1ab   : > { %1259 = vrot.lane.b32.xlu1 %v1220_v47, %s2211_s8  ;;  %v3643_v47 = vld [vmem:[%s3833_s3] ss:$0 sm:$0xff] }
 0x1ac   : > { %1249 = vrot.lane.b32.xlu0 %v1210_v58, %s2211_s8  ;;  %v983_v10 = vpop.permute.xlu2 %982 }
 0x1ad   : > { %v921_v19 = vpop.permute.xlu1 %920 }
 0x1ae   : > { %v1234_v42 = vpop.permute.xlu0 %1233  ;;  %v1420_v26 = vsel %vm1384_vm9, %v3124_v50, %v921_v19 }
 0x1af   : > { %v1562_v20 = vsel %vm1548_vm14, %v1521_v46, %v1234_v42 }
 0x1b0   : > { %2089 = vmatmul.msk.bf16.gmra.mxu1 %vm1600_vm15, %v1562_v20 }
 0x1b2   : > { %1028 = vrot.lane.b32.xlu2 %v4028_v32, %s2209_s6 }
 0x1b3   : > { %1018 = vrot.lane.b32.xlu1 %v4027_v22, %s2209_s6 }
 0x1b4   : > { %986 = vrot.lane.b32.xlu0 %v3500_v12, %s2208_s5  ;;  %v1144_v29 = vpop.permute.xlu2 %1143  ;;  %v1451_v12 = vsel %vm1425_vm11, %v3291_v34, %v993_v56  ;;  %v1200_v34 = vsel %vm1179_vm8, %v1197_v37, %v4031_v23 }
 0x1b5   : > { %v1035_v51 = vpop.permute.xlu1 %1034 }
 0x1b6   : > { %v1003_v38 = vpop.permute.xlu0 %1002  ;;  %v1492_v14 = vsel %vm1466_vm12, %v1451_v12, %v1035_v51 }
 0x1b7   : > { %v1461_v56 = vsel %vm1425_vm11, %v1420_v26, %v1003_v38 }
 0x1b8   : > { %v1502_v1 = vsel %vm1466_vm12, %v1461_v56, %v1045_v21  ;;  %v1441_v21 = vsel %vm1425_vm11, %v3218_v11, %v983_v10 }
 0x1ba   : > { %1229 = vrot.lane.b32.xlu2 %v1190_v0, %s2211_s8 }
 0x1bb   : > { %1157 = vrot.lane.b32.xlu1 %v1093_v3, %s2210_s7 }
 0x1bc   : > { %1147 = vrot.lane.b32.xlu0 %v1073_v45, %s2210_s7  ;;  %v1236_v53 = vpop.permute.xlu2 %1235 }
 0x1bd   : > { %v1174_v28 = vpop.permute.xlu1 %1173 }
 0x1be   : > { %v1164_v57 = vpop.permute.xlu0 %1163  ;;  %v1543_v6 = vsel %vm1507_vm13, %v1502_v1, %v1174_v28 }
 0x1bf   : > { %v1533_v63 = vsel %vm1507_vm13, %v1492_v14, %v1164_v57 }
 0x1c0   : > { %v1574_v31 = vsel %vm1548_vm14, %v1533_v63, %v1246_v25 }
 0x1c1   : > { %2095 = vmatmul.msk.bf16.gmra.mxu2 %vm1600_vm15, %v1574_v31 }
 0x1c4   : > { %1239 = vrot.lane.b32.xlu0 %v1200_v34, %s2211_s8  ;;  %v1005_v44 = vpop.permute.xlu2 %1004 }
 0x1c5   : > { %v973_v4 = vpop.permute.xlu1 %972 }
 0x1c6   : > { %v1256_v33 = vpop.permute.xlu0 %1255  ;;  %v1431_v7 = vsel %vm1425_vm11, %v3062_v35, %v973_v4 }
 0x1c7   : > { %v1584_v50 = vsel %vm1548_vm14, %v1543_v6, %v1256_v33 }
 0x1c8   : > { %2100 = vmatmul.msk.bf16.gmra.mxu3 %vm1600_vm15, %v1584_v50 }
 0x1cc   : > { %v1166_v55 = vpop.permute.xlu2 %1165 }
 0x1cd   : > { %v1025_v52 = vpop.permute.xlu1 %1024 }
 0x1ce   : > { %v1015_v2 = vpop.permute.xlu0 %1014  ;;  %v1482_v36 = vsel %vm1466_vm12, %v1441_v21, %v1025_v52 }
 0x1cf   : > { %v1472_v37 = vsel %vm1466_vm12, %v1431_v7, %v1015_v2 }
 0x1d0   : > { %v1513_v59 = vsel %vm1507_vm13, %v1472_v37, %v1144_v29 }
 0x1d4   : > { %v1258_v24 = vpop.permute.xlu2 %1257 }
 0x1d5   : > { %v1226_v60 = vpop.permute.xlu1 %1225 }
 0x1d6   : > { %v1154_v43 = vpop.permute.xlu0 %1153  ;;  %v1554_v40 = vsel %vm1548_vm14, %v1513_v59, %v1226_v60 }
 0x1d7   : > { %v1523_v25 = vsel %vm1507_vm13, %v1482_v36, %v1154_v43  ;;  %2085 = vmatmul.msk.bf16.gmra.mxu0 %vm1600_vm15, %v1554_v40 }
 0x1d8   : > { %v1564_v35 = vsel %vm1548_vm14, %v1523_v25, %v1236_v53 }
 0x1d9   : > { %2090 = vmatmul.msk.bf16.gmra.mxu1 %vm1600_vm15, %v1564_v35 }
 0x1dc   : > { %v1017_v62 = vpop.permute.xlu2 %1016 }
 0x1dd   : > { %v995_v54 = vpop.permute.xlu1 %994 }
 0x1de   : > { %v923_v11 = vpop.permute.xlu0 %922  ;;  %v1453_v61 = vsel %vm1425_vm11, %v3287_v18, %v995_v54 }
 0x1df   : > { %v1422_v58 = vsel %vm1384_vm9, %v3117_v16, %v923_v11 }
 0x1e0   : > { %v1463_v46 = vsel %vm1425_vm11, %v1422_v58, %v1005_v44 }
 0x1e4   : > { %v1156_v0 = vpop.permute.xlu2 %1155 }
 0x1e5   : > { %v1047_v41 = vpop.permute.xlu1 %1046 }
 0x1e6   : > { %v1037_v9 = vpop.permute.xlu0 %1036  ;;  %v1504_v18 = vsel %vm1466_vm12, %v1463_v46, %v1047_v41 }
 0x1e7   : > { %v1494_v48 = vsel %vm1466_vm12, %v1453_v61, %v1037_v9 }
 0x1e8   : > { %v1535_v32 = vsel %vm1507_vm13, %v1494_v48, %v1166_v55 }
 0x1ea   : > { %v1707_v13 = vpop.f32.mrf.mxu2 }
 0x1eb   : > { %v1708_v19 = vadd.f32 %v3643_v47, %v1707_v13 }
 0x1ec   : > { %v1732_v10 = vpop.f32.mrf.mxu3  ;;  %v925_v34 = vpop.permute.xlu2 %924 }
 0x1ed   : > { %v1777_v42 = vmax.f32 %v1708_v19, 0.0  ;;  %v1733_v20 = vadd.f32 %v3643_v47, %v1732_v10  ;;  %v1248_v22 = vpop.permute.xlu1 %1247  ;;  %v1424_v46 = vsel %vm1384_vm9, %v3023_v5, %v925_v34 }
 0x1ee   : > { %v1176_v16 = vpop.permute.xlu0 %1175  ;;  %v1576_v51 = vsel %vm1548_vm14, %v1535_v32, %v1248_v22 }
 0x1ef   : > { %v1817_v29 = vpack.c.bf16 %v1777_v42, %v1777_v42  ;;  %v1787_v38 = vmax.f32 %v1733_v20, 0.0  ;;  %v1545_v49 = vsel %vm1507_vm13, %v1504_v18, %v1176_v16  ;;  %2096 = vmatmul.msk.bf16.gmra.mxu2 %vm1600_vm15, %v1576_v51 }
 0x1f0   : > { %v1586_v3 = vsel %vm1548_vm14, %v1545_v49, %v1258_v24 }
 0x1f1   : > { %1858 = vst.msk [vmem:[%s3659_s22 + $0x50] sm:$0xf] %vm1837_vm0, %v1817_v29  ;;  %v1827_v27 = vpack.c.bf16 %v1787_v38, %v1787_v38  ;;  %2101 = vmatmul.msk.bf16.gmra.mxu3 %vm1600_vm15, %v1586_v3 }
 0x1f2   : > { %v1709_v45 = vpop.f32.mrf.mxu2 }
 0x1f3   : > { %1868 = vst.msk [vmem:[%s3659_s22 + $0x78] sm:$0xf] %vm1837_vm0, %v1827_v27  ;;  %v1710_v12 = vadd.f32 %v3643_v47, %v1709_v45 }
 0x1f4   : > { %v1734_v28 = vpop.f32.mrf.mxu3  ;;  %v1039_v24 = vpop.permute.xlu2 %1038 }
 0x1f5   : > { %v1778_v14 = vmax.f32 %v1710_v12, 0.0  ;;  %v1735_v57 = vadd.f32 %v3643_v47, %v1734_v28  ;;  %v985_v63 = vpop.permute.xlu1 %984 }
 0x1f6   : > { %v975_v53 = vpop.permute.xlu0 %974  ;;  %v1443_v2 = vsel %vm1425_vm11, %v3120_v17, %v985_v63 }
 0x1f7   : > { %v1818_v31 = vpack.c.bf16 %v1778_v14, %v1778_v14  ;;  %v1788_v26 = vmax.f32 %v1735_v57, 0.0  ;;  %v1433_v37 = vsel %vm1425_vm11, %v3194_v30, %v975_v53 }
 0x1f8   : > { %v1474_v59 = vsel %vm1466_vm12, %v1433_v37, %v1017_v62 }
 0x1f9   : > { %1859 = vst.msk [vmem:[%s3659_s22 + $0x54] sm:$0xf] %vm1837_vm0, %v1818_v31  ;;  %v1828_v23 = vpack.c.bf16 %v1788_v26, %v1788_v26 }
 0x1fb   : > { %1869 = vst.msk [vmem:[%s3659_s22 + $0x7c] sm:$0xf] %vm1837_vm0, %v1828_v23 }
 0x1fc   : > { %v1682_v56 = vpop.f32.mrf.mxu1  ;;  %v1178_v13 = vpop.permute.xlu2 %1177 }
 0x1fd   : > { %v1657_v1 = vpop.f32.mrf.mxu0  ;;  %v1683_v4 = vadd.f32 %v3643_v47, %v1682_v56  ;;  %v1146_v6 = vpop.permute.xlu1 %1145 }
 0x1fe   : > { %v1658_v33 = vadd.f32 %v3643_v47, %v1657_v1  ;;  %v1027_v50 = vpop.permute.xlu0 %1026  ;;  %v1515_v30 = vsel %vm1507_vm13, %v1474_v59, %v1146_v6 }
 0x1ff   : > { %v1767_v44 = vmax.f32 %v1683_v4, 0.0  ;;  %v1484_v21 = vsel %vm1466_vm12, %v1443_v2, %v1027_v50 }
 0x200   : > { %v1757_v52 = vmax.f32 %v1658_v33, 0.0  ;;  %v1525_v40 = vsel %vm1507_vm13, %v1484_v21, %v1156_v0 }
 0x201   : > { %v1807_v7 = vpack.c.bf16 %v1767_v44, %v1767_v44 }
 0x202   : > { %v1797_v55 = vpack.c.bf16 %v1757_v52, %v1757_v52 }
 0x203   : > { %1848 = vst.msk [vmem:[%s3659_s22 + $0x28] sm:$0xf] %vm1837_vm0, %v1807_v7 }
 0x204   : > { %1838 = vst.msk [vmem:[%s3659_s22] sm:$0xf] %vm1837_vm0, %v1797_v55  ;;  %v1684_v60 = vpop.f32.mrf.mxu1  ;;  %v977_v18 = vpop.permute.xlu2 %976 }
 0x205   : > { %v1659_v36 = vpop.f32.mrf.mxu0  ;;  %v1685_v43 = vadd.f32 %v3643_v47, %v1684_v60  ;;  %v1238_v17 = vpop.permute.xlu1 %1237  ;;  %v1435_v2 = vsel %vm1425_vm11, %v3187_v8, %v977_v18 }
 0x206   : > { %v1660_v25 = vadd.f32 %v3643_v47, %v1659_v36  ;;  %v1228_v35 = vpop.permute.xlu0 %1227  ;;  %v1566_v54 = vsel %vm1548_vm14, %v1525_v40, %v1238_v17 }
 0x207   : > { %v1768_v11 = vmax.f32 %v1685_v43, 0.0  ;;  %v1556_v41 = vsel %vm1548_vm14, %v1515_v30, %v1228_v35  ;;  %2091 = vmatmul.msk.bf16.gmra.mxu1 %vm1600_vm15, %v1566_v54 }
 0x208   : > { %v1758_v9 = vmax.f32 %v1660_v25, 0.0  ;;  %2086 = vmatmul.msk.bf16.gmra.mxu0 %vm1600_vm15, %v1556_v41 }
 0x209   : > { %v1808_v62 = vpack.c.bf16 %v1768_v11, %v1768_v11 }
 0x20a   : > { %v1798_v61 = vpack.c.bf16 %v1758_v9, %v1758_v9 }
 0x20b   : > { %1849 = vst.msk [vmem:[%s3659_s22 + $0x2c] sm:$0xf] %vm1837_vm0, %v1808_v62 }
 0x20c   : > { %1839 = vst.msk [vmem:[%s3659_s22 + $0x4] sm:$0xf] %vm1837_vm0, %v1798_v61  ;;  %v1029_v31 = vpop.permute.xlu2 %1028 }
 0x20d   : > { %v1007_v58 = vpop.permute.xlu1 %1006 }
 0x20e   : > { %v997_v48 = vpop.permute.xlu0 %996  ;;  %v1465_v42 = vsel %vm1425_vm11, %v1424_v46, %v1007_v58 }
 0x20f   : > { %v1455_v20 = vsel %vm1425_vm11, %v3190_v39, %v997_v48 }
 0x210   : > { %v1496_v38 = vsel %vm1466_vm12, %v1455_v20, %v1039_v24 }
 0x214   : > { %v1230_v37 = vpop.permute.xlu2 %1229 }
 0x215   : > { %v1168_v19 = vpop.permute.xlu1 %1167 }
 0x216   : > { %v1049_v10 = vpop.permute.xlu0 %1048  ;;  %v1537_v27 = vsel %vm1507_vm13, %v1496_v38, %v1168_v19 }
 0x217   : > { %v1506_v22 = vsel %vm1466_vm12, %v1465_v42, %v1049_v10 }
 0x218   : > { %v1547_v3 = vsel %vm1507_vm13, %v1506_v22, %v1178_v13 }
 0x21a   : > { %v1737_v32 = vpop.f32.mrf.mxu3 }
 0x21b   : > { %v1712_v16 = vpop.f32.mrf.mxu2  ;;  %v1738_v51 = vadd.f32 %v3643_v47, %v1737_v32 }
 0x21c   : > { %v1713_v29 = vadd.f32 %v3643_v47, %v1712_v16 }
 0x21d   : > { %v1789_v49 = vmax.f32 %v1738_v51, 0.0  ;;  %v1260_v5 = vpop.permute.xlu1 %1259 }
 0x21e   : > { %v1779_v39 = vmax.f32 %v1713_v29, 0.0  ;;  %v1250_v0 = vpop.permute.xlu0 %1249  ;;  %v1588_v45 = vsel %vm1548_vm14, %v1547_v3, %v1260_v5 }
 0x21f   : > { %v1829_v12 = vpack.c.bf16 %v1789_v49, %v1789_v49  ;;  %v1578_v28 = vsel %vm1548_vm14, %v1537_v27, %v1250_v0  ;;  %2102 = vmatmul.msk.bf16.gmra.mxu3 %vm1600_vm15, %v1588_v45 }
 0x220   : > { %v1819_v14 = vpack.c.bf16 %v1779_v39, %v1779_v39  ;;  %2097 = vmatmul.msk.bf16.gmra.mxu2 %vm1600_vm15, %v1578_v28 }
 0x221   : > { %1870 = vst.msk [vmem:[%s3659_s22 + $0x80] sm:$0xf] %vm1837_vm0, %v1829_v12 }
 0x222   : > { %1860 = vst.msk [vmem:[%s3659_s22 + $0x58] sm:$0xf] %vm1837_vm0, %v1819_v14  ;;  %v1739_v57 = vpop.f32.mrf.mxu3 }
 0x223   : > { %v1714_v63 = vpop.f32.mrf.mxu2  ;;  %v1740_v53 = vadd.f32 %v3643_v47, %v1739_v57 }
 0x224   : > { %v1715_v26 = vadd.f32 %v3643_v47, %v1714_v63 }
 0x225   : > { %v1790_v23 = vmax.f32 %v1740_v53, 0.0  ;;  %v1019_v50 = vpop.permute.xlu1 %1018 }
 0x226   : > { %v1780_v34 = vmax.f32 %v1715_v26, 0.0  ;;  %v1662_v56 = vpop.f32.mrf.mxu0  ;;  %v987_v1 = vpop.permute.xlu0 %986  ;;  %v1476_v55 = vsel %vm1466_vm12, %v1435_v2, %v1019_v50 }
 0x227   : > { %v1830_v4 = vpack.c.bf16 %v1790_v23, %v1790_v23  ;;  %v1663_v6 = vadd.f32 %v3643_v47, %v1662_v56  ;;  %v1445_v30 = vsel %vm1425_vm11, %v3265_v15, %v987_v1 }
 0x228   : > { %v1820_v33 = vpack.c.bf16 %v1780_v34, %v1780_v34  ;;  %v1486_v24 = vsel %vm1466_vm12, %v1445_v30, %v1029_v31 }
 0x229   : > { %1871 = vst.msk [vmem:[%s3659_s22 + $0x84] sm:$0xf] %vm1837_vm0, %v1830_v4  ;;  %v1759_v44 = vmax.f32 %v1663_v6, 0.0 }
 0x22a   : > { %1861 = vst.msk [vmem:[%s3659_s22 + $0x5c] sm:$0xf] %vm1837_vm0, %v1820_v33 }
 0x22b   : > { %v1799_v52 = vpack.c.bf16 %v1759_v44, %v1759_v44 }
 0x22d   : > { %1840 = vst.msk [vmem:[%s3659_s22 + $0x8] sm:$0xf] %vm1837_vm0, %v1799_v52  ;;  %v1687_v7 = vpop.f32.mrf.mxu1  ;;  %v1158_v35 = vpop.permute.xlu1 %1157 }
 0x22e   : > { %v1688_v21 = vadd.f32 %v3643_v47, %v1687_v7  ;;  %v1664_v60 = vpop.f32.mrf.mxu0  ;;  %v1148_v59 = vpop.permute.xlu0 %1147  ;;  %v1527_v41 = vsel %vm1507_vm13, %v1486_v24, %v1158_v35 }
 0x22f   : > { %v1665_v36 = vadd.f32 %v3643_v47, %v1664_v60  ;;  %v1517_v43 = vsel %vm1507_vm13, %v1476_v55, %v1148_v59 }
 0x230   : > { %v1769_v17 = vmax.f32 %v1688_v21, 0.0  ;;  %v1558_v40 = vsel %vm1548_vm14, %v1517_v43, %v1230_v37 }
 0x231   : > { %v1760_v8 = vmax.f32 %v1665_v36, 0.0  ;;  %2087 = vmatmul.msk.bf16.gmra.mxu0 %vm1600_vm15, %v1558_v40 }
 0x232   : > { %v1809_v25 = vpack.c.bf16 %v1769_v17, %v1769_v17 }
 0x233   : > { %v1800_v54 = vpack.c.bf16 %v1760_v8, %v1760_v8 }
 0x234   : > { %1850 = vst.msk [vmem:[%s3659_s22 + $0x30] sm:$0xf] %vm1837_vm0, %v1809_v25 }
 0x235   : > { %1841 = vst.msk [vmem:[%s3659_s22 + $0xc] sm:$0xf] %vm1837_vm0, %v1800_v54  ;;  %v1689_v11 = vpop.f32.mrf.mxu1 }
 0x236   : > { %v1690_v9 = vadd.f32 %v3643_v47, %v1689_v11  ;;  %v1240_v62 = vpop.permute.xlu0 %1239 }
 0x237   : > { %v1568_v61 = vsel %vm1548_vm14, %v1527_v41, %v1240_v62 }
 0x238   : > { %v1770_v58 = vmax.f32 %v1690_v9, 0.0  ;;  %2092 = vmatmul.msk.bf16.gmra.mxu1 %vm1600_vm15, %v1568_v61 }
 0x23a   : > { %v1810_v15 = vpack.c.bf16 %v1770_v58, %v1770_v58 }
 0x23c   : > { %1851 = vst.msk [vmem:[%s3659_s22 + $0x34] sm:$0xf] %vm1837_vm0, %v1810_v15 }
 0x244   : > { %v1717_v48 = vpop.f32.mrf.mxu2 }
 0x245   : > { %v1718_v13 = vadd.f32 %v3643_v47, %v1717_v48 }
 0x247   : > { %v1781_v19 = vmax.f32 %v1718_v13, 0.0 }
 0x249   : > { %v1821_v10 = vpack.c.bf16 %v1781_v19, %v1781_v19 }
 0x24b   : > { %1862 = vst.msk [vmem:[%s3659_s22 + $0x60] sm:$0xf] %vm1837_vm0, %v1821_v10  ;;  %v1742_v46 = vpop.f32.mrf.mxu3 }
 0x24c   : > { %v1743_v42 = vadd.f32 %v3643_v47, %v1742_v46  ;;  %v1719_v20 = vpop.f32.mrf.mxu2 }
 0x24d   : > { %v1720_v22 = vadd.f32 %v3643_v47, %v1719_v20 }
 0x24e   : > { %v1791_v32 = vmax.f32 %v1743_v42, 0.0 }
 0x24f   : > { %v1782_v18 = vmax.f32 %v1720_v22, 0.0 }
 0x250   : > { %v1831_v16 = vpack.c.bf16 %v1791_v32, %v1791_v32 }
 0x251   : > { %v1822_v51 = vpack.c.bf16 %v1782_v18, %v1782_v18 }
 0x252   : > { %1872 = vst.msk [vmem:[%s3659_s22 + $0x88] sm:$0xf] %vm1837_vm0, %v1831_v16 }
 0x253   : > { %1863 = vst.msk [vmem:[%s3659_s22 + $0x64] sm:$0xf] %vm1837_vm0, %v1822_v51  ;;  %v1744_v29 = vpop.f32.mrf.mxu3 }
 0x254   : > { %v1745_v38 = vadd.f32 %v3643_v47, %v1744_v29  ;;  %v1667_v49 = vpop.f32.mrf.mxu0 }
 0x255   : > { %v1668_v5 = vadd.f32 %v3643_v47, %v1667_v49 }
 0x256   : > { %v1792_v3 = vmax.f32 %v1745_v38, 0.0  ;;  %v1692_v27 = vpop.f32.mrf.mxu1 }
 0x257   : > { %v1761_v39 = vmax.f32 %v1668_v5, 0.0  ;;  %v1693_v0 = vadd.f32 %v3643_v47, %v1692_v27 }
 0x258   : > { %v1832_v45 = vpack.c.bf16 %v1792_v3, %v1792_v3 }
 0x259   : > { %v1801_v12 = vpack.c.bf16 %v1761_v39, %v1761_v39  ;;  %v1771_v28 = vmax.f32 %v1693_v0, 0.0 }
 0x25a   : > { %1873 = vst.msk [vmem:[%s3659_s22 + $0x8c] sm:$0xf] %vm1837_vm0, %v1832_v45 }
 0x25b   : > { %1842 = vst.msk [vmem:[%s3659_s22 + $0x10] sm:$0xf] %vm1837_vm0, %v1801_v12  ;;  %v1811_v14 = vpack.c.bf16 %v1771_v28, %v1771_v28 }
 0x25c   : > { %v1669_v57 = vpop.f32.mrf.mxu0 }
 0x25d   : > { %1852 = vst.msk [vmem:[%s3659_s22 + $0x38] sm:$0xf] %vm1837_vm0, %v1811_v14  ;;  %v1670_v63 = vadd.f32 %v3643_v47, %v1669_v57 }
 0x25e   : > { %v1694_v53 = vpop.f32.mrf.mxu1 }
 0x25f   : > { %v1762_v31 = vmax.f32 %v1670_v63, 0.0  ;;  %v1695_v26 = vadd.f32 %v3643_v47, %v1694_v53 }
 0x261   : > { %v1802_v23 = vpack.c.bf16 %v1762_v31, %v1762_v31  ;;  %v1772_v34 = vmax.f32 %v1695_v26, 0.0 }
 0x263   : > { %1843 = vst.msk [vmem:[%s3659_s22 + $0x14] sm:$0xf] %vm1837_vm0, %v1802_v23  ;;  %v1812_v56 = vpack.c.bf16 %v1772_v34, %v1772_v34 }
 0x265   : > { %1853 = vst.msk [vmem:[%s3659_s22 + $0x3c] sm:$0xf] %vm1837_vm0, %v1812_v56 }
 0x272   : > { %v1722_v1 = vpop.f32.mrf.mxu2 }
 0x273   : > { %v1723_v4 = vadd.f32 %v3643_v47, %v1722_v1 }
 0x274   : > { %v1747_v6 = vpop.f32.mrf.mxu3 }
 0x275   : > { %v1783_v33 = vmax.f32 %v1723_v4, 0.0  ;;  %v1748_v50 = vadd.f32 %v3643_v47, %v1747_v6 }
 0x277   : > { %v1823_v44 = vpack.c.bf16 %v1783_v33, %v1783_v33  ;;  %v1793_v52 = vmax.f32 %v1748_v50, 0.0 }
 0x279   : > { %1864 = vst.msk [vmem:[%s3659_s22 + $0x68] sm:$0xf] %vm1837_vm0, %v1823_v44  ;;  %v1833_v2 = vpack.c.bf16 %v1793_v52, %v1793_v52 }
 0x27a   : > { %v1724_v7 = vpop.f32.mrf.mxu2 }
 0x27b   : > { %1874 = vst.msk [vmem:[%s3659_s22 + $0x90] sm:$0xf] %vm1837_vm0, %v1833_v2  ;;  %v1725_v37 = vadd.f32 %v3643_v47, %v1724_v7 }
 0x27c   : > { %v1749_v55 = vpop.f32.mrf.mxu3 }
 0x27d   : > { %v1784_v21 = vmax.f32 %v1725_v37, 0.0  ;;  %v1750_v60 = vadd.f32 %v3643_v47, %v1749_v55 }
 0x27f   : > { %v1824_v59 = vpack.c.bf16 %v1784_v21, %v1784_v21  ;;  %v1794_v36 = vmax.f32 %v1750_v60, 0.0 }
 0x281   : > { %1865 = vst.msk [vmem:[%s3659_s22 + $0x6c] sm:$0xf] %vm1837_vm0, %v1824_v59  ;;  %v1834_v43 = vpack.c.bf16 %v1794_v36, %v1794_v36 }
 0x283   : > { %1875 = vst.msk [vmem:[%s3659_s22 + $0x94] sm:$0xf] %vm1837_vm0, %v1834_v43 }
 0x284   : > { %v1697_v17 = vpop.f32.mrf.mxu1 }
 0x285   : > { %v1672_v40 = vpop.f32.mrf.mxu0  ;;  %v1698_v8 = vadd.f32 %v3643_v47, %v1697_v17 }
 0x286   : > { %v1673_v30 = vadd.f32 %v3643_v47, %v1672_v40 }
 0x287   : > { %v1773_v25 = vmax.f32 %v1698_v8, 0.0 }
 0x288   : > { %v1763_v35 = vmax.f32 %v1673_v30, 0.0 }
 0x289   : > { %v1813_v54 = vpack.c.bf16 %v1773_v25, %v1773_v25 }
 0x28a   : > { %v1803_v24 = vpack.c.bf16 %v1763_v35, %v1763_v35 }
 0x28b   : > { %1854 = vst.msk [vmem:[%s3659_s22 + $0x40] sm:$0xf] %vm1837_vm0, %v1813_v54 }
 0x28c   : > { %1844 = vst.msk [vmem:[%s3659_s22 + $0x18] sm:$0xf] %vm1837_vm0, %v1803_v24  ;;  %v1699_v11 = vpop.f32.mrf.mxu1 }
 0x28d   : > { %v1674_v41 = vpop.f32.mrf.mxu0  ;;  %v1700_v9 = vadd.f32 %v3643_v47, %v1699_v11 }
 0x28e   : > { %v1675_v62 = vadd.f32 %v3643_v47, %v1674_v41 }
 0x28f   : > { %v1774_v61 = vmax.f32 %v1700_v9, 0.0 }
 0x290   : > { %v1764_v58 = vmax.f32 %v1675_v62, 0.0 }
 0x291   : > { %v1814_v15 = vpack.c.bf16 %v1774_v61, %v1774_v61 }
 0x292   : > { %v1804_v48 = vpack.c.bf16 %v1764_v58, %v1764_v58 }
 0x293   : > { %1855 = vst.msk [vmem:[%s3659_s22 + $0x44] sm:$0xf] %vm1837_vm0, %v1814_v15 }
 0x294   : > { %1845 = vst.msk [vmem:[%s3659_s22 + $0x1c] sm:$0xf] %vm1837_vm0, %v1804_v48 }
 0x2a2   : > { %v1752_v13 = vpop.f32.mrf.mxu3 }
 0x2a3   : > { %v1727_v19 = vpop.f32.mrf.mxu2  ;;  %v1753_v10 = vadd.f32 %v3643_v47, %v1752_v13 }
 0x2a4   : > { %v1728_v46 = vadd.f32 %v3643_v47, %v1727_v19 }
 0x2a5   : > { %v1795_v42 = vmax.f32 %v1753_v10, 0.0 }
 0x2a6   : > { %v1785_v20 = vmax.f32 %v1728_v46, 0.0 }
 0x2a7   : > { %v1835_v22 = vpack.c.bf16 %v1795_v42, %v1795_v42 }
 0x2a8   : > { %v1825_v32 = vpack.c.bf16 %v1785_v20, %v1785_v20 }
 0x2a9   : > { %1876 = vst.msk [vmem:[%s3659_s22 + $0x98] sm:$0xf] %vm1837_vm0, %v1835_v22 }
 0x2aa   : > { %1866 = vst.msk [vmem:[%s3659_s22 + $0x70] sm:$0xf] %vm1837_vm0, %v1825_v32  ;;  %v1754_v18 = vpop.f32.mrf.mxu3 }
 0x2ab   : > { %v1729_v16 = vpop.f32.mrf.mxu2  ;;  %v1755_v51 = vadd.f32 %v3643_v47, %v1754_v18 }
 0x2ac   : > { %v1730_v29 = vadd.f32 %v3643_v47, %v1729_v16 }
 0x2ad   : > { %v1796_v38 = vmax.f32 %v1755_v51, 0.0 }
 0x2ae   : > { %v1786_v49 = vmax.f32 %v1730_v29, 0.0  ;;  %v1677_v5 = vpop.f32.mrf.mxu0 }
 0x2af   : > { %v1836_v3 = vpack.c.bf16 %v1796_v38, %v1796_v38  ;;  %v1678_v27 = vadd.f32 %v3643_v47, %v1677_v5 }
 0x2b0   : > { %v1826_v39 = vpack.c.bf16 %v1786_v49, %v1786_v49 }
 0x2b1   : > { %1877 = vst.msk [vmem:[%s3659_s22 + $0x9c] sm:$0xf] %vm1837_vm0, %v1836_v3  ;;  %v1765_v0 = vmax.f32 %v1678_v27, 0.0 }
 0x2b2   : > { %1867 = vst.msk [vmem:[%s3659_s22 + $0x74] sm:$0xf] %vm1837_vm0, %v1826_v39 }
 0x2b3   : > { %v1805_v45 = vpack.c.bf16 %v1765_v0, %v1765_v0 }
 0x2b5   : > { %1846 = vst.msk [vmem:[%s3659_s22 + $0x20] sm:$0xf] %vm1837_vm0, %v1805_v45  ;;  %v1702_v12 = vpop.f32.mrf.mxu1 }
 0x2b6   : > { %v1703_v28 = vadd.f32 %v3643_v47, %v1702_v12  ;;  %v1679_v14 = vpop.f32.mrf.mxu0 }
 0x2b7   : > { %v1680_v57 = vadd.f32 %v3643_v47, %v1679_v14 }
 0x2b8   : > { %v1775_v63 = vmax.f32 %v1703_v28, 0.0 }
 0x2b9   : > { %v1766_v53 = vmax.f32 %v1680_v57, 0.0 }
 0x2ba   : > { %v1815_v31 = vpack.c.bf16 %v1775_v63, %v1775_v63 }
 0x2bb   : > { %v1806_v26 = vpack.c.bf16 %v1766_v53, %v1766_v53 }
 0x2bc   : > { %1856 = vst.msk [vmem:[%s3659_s22 + $0x48] sm:$0xf] %vm1837_vm0, %v1815_v31 }
 0x2bd   : > { %1847 = vst.msk [vmem:[%s3659_s22 + $0x24] sm:$0xf] %vm1837_vm0, %v1806_v26  ;;  %v1704_v23 = vpop.f32.mrf.mxu1 }
 0x2be   : > { %v1705_v34 = vadd.f32 %v3643_v47, %v1704_v23 }
 0x2c0   : > { %v1776_v56 = vmax.f32 %v1705_v34, 0.0 }
 0x2c2   : > { %v1816_v1 = vpack.c.bf16 %v1776_v56, %v1776_v56 }
 0x2c4   : > { %1857 = vst.msk [vmem:[%s3659_s22 + $0x4c] sm:$0xf] %vm1837_vm0, %v1816_v1 }
 0x2c5 PF: > { %s14_s17 = sadd.s32 1, %s2202_s17   ;;  %s4032_s15 = smov %s2198_s16 }
 0x2c6   : > { %p11_p5 = scmp.ge.s32.totalorder %s14_s17, 4   ;;  %s4033_s16 = smov %s4035_s18 }
 0x2c8   :  { %13 = sbr.rel (!%p11_p5) target bundleno = 2 (0x2), region = 69 }

</bundles_post_ra>
